<compile_context>
chip_gen: v6e
topology: v6e:2x2x1
jax: 0.10.0
libtpu: 0.0.40
codegen_flags: <defaults>
</compile_context>

<pallas_src>
import jax
import jax.numpy as jnp
import numpy as np
from jax.experimental import pallas as pl
from jax.experimental.pallas import tpu as pltpu

# ----------------------------- hyper-parameters ------------------------------
B = 2           # batch
T = 8           # input sequence length
C_IN = 4        # cnn_in_channels  (feature dim of x_seq)
C_OUT = 8       # cnn_out_channels1
K = 3           # cnn_kernel_size1 (valid conv, stride 1)
L = T - K + 1   # conv output length
H = 16          # GRU hidden_size
NUM_LAYERS = 2  # GRU num_layers (fixed at 2 here)
RU_NUM = 10     # ru_num_embeddings
RU_DIM = 8      # ru_embedding_dim
MO_NUM = 12     # mo_num_embeddings
MO_DIM = 8      # mo_embedding_dim
S_DIM = 4       # static_feature_dim
FC_HID = 32     # fc_hidden_dim
GATE = 128      # per-gate lane padding (one full vreg lane block)
ACT_COLS = K * C_IN + S_DIM   # packed activation block width (12 + 4 = 16)
# dropout_prob: inference mode -> identity.

# --------------------- wide slab (384 lanes): recurrence weights -------------
W_HH0 = 0                    # (H, 3*GATE)  layer-0 hidden->gates, gate-padded
W_IH1 = 16                   # (H, 3*GATE)  layer-1 input ->gates, gate-padded
W_HH1 = 32                   # (H, 3*GATE)  layer-1 hidden->gates, gate-padded
W_IH0 = 48                   # (C_OUT, 3*GATE)
BIASW = 56                   # row 0: b_gi0, row 1: b_gi1, row 2: b_hn0, row 3: b_hn1
WIDE_ROWS = 64

# --------------------- narrow slab (128 lanes): head / conv / tables ---------
N_CONV_W = 0                 # (K*C_IN, C_OUT)
N_RU_FC = 16                 # (RU_NUM, FC_HID)   ru_tab @ w1_ru (folded through fc1)
N_MO_FC = 32                 # (MO_NUM, FC_HID)   mo_tab @ w1_mo
N_W1_SEQ = 48                # (H, FC_HID)
N_W1_ST = 64                 # (S_DIM, FC_HID)
N_W2 = 72                    # (FC_HID, 128)      w2 lane-padded
N_BIAS = 104                 # row 0: conv_b, row 1: b_fc1, row 2: b2 (lane-padded)
NARROW_ROWS = 112


def _sigmoid(x):
    # single EUP push (tanh) instead of exp/div expansion
    return 0.5 * (jnp.tanh(0.5 * x) + 1.0)


def _silu(x):
    return x * _sigmoid(x)


def _cell(gi, gh, h, b_hn_b):
    """One GRU cell on gate-padded blocks.

    gi, gh: (B, 3*GATE) with gate g at lanes [g*GATE : g*GATE+H]; gi already
    includes b_ih (+ b_hh for r,z).  h: (B, H).  b_hn_b: (B, GATE)."""
    r = _sigmoid(gi[:, 0:GATE] + gh[:, 0:GATE])
    z = _sigmoid(gi[:, GATE:2 * GATE] + gh[:, GATE:2 * GATE])
    n = jnp.tanh(gi[:, 2 * GATE:3 * GATE] + r * (gh[:, 2 * GATE:3 * GATE] + b_hn_b))
    zs = z[:, :H]
    ns = n[:, :H]
    return (1.0 - zs) * ns + zs * h


def cnn_gru_energy_kernel(
    idx_ref,     # (2*B,) int32 SMEM: [ru_0..ru_{B-1}, mo_0..mo_{B-1}]
    act_ref,     # (L*B, ACT_COLS) f32 VMEM: [:, :K*C_IN]=im2col, [0:B, K*C_IN:]=x_static
    nslab_ref,   # (NARROW_ROWS, 128) f32 VMEM
    wslab_ref,   # (WIDE_ROWS, 3*GATE) f32 VMEM
    out_ref,     # (B, 128) f32 VMEM (lane-dense; col 0 holds the result)
    emb_ref,     # (B, FC_HID) f32 VMEM scratch
):
    # ---- embeddings first (independent of the recurrence; overlaps with it) --
    for b in range(B):
        ru_i = idx_ref[b]
        mo_i = idx_ref[B + b]
        ru_row = nslab_ref[pl.ds(N_RU_FC + ru_i, 1), pl.ds(0, FC_HID)]   # (1, FC_HID)
        mo_row = nslab_ref[pl.ds(N_MO_FC + mo_i, 1), pl.ds(0, FC_HID)]
        emb_ref[b:b + 1, :] = ru_row + mo_row

    # ---- hoist weight/bias loads (one-time) -----------------------------------
    w_hh0p = wslab_ref[W_HH0:W_HH0 + H, :]                 # (H, 3*GATE)
    w_ih1p = wslab_ref[W_IH1:W_IH1 + H, :]                 # (H, 3*GATE)
    w_cat = jnp.concatenate([w_hh0p, w_ih1p], axis=1)      # (H, 6*GATE) fused
    w_hh1p = wslab_ref[W_HH1:W_HH1 + H, :]                 # (H, 3*GATE)
    w_ih0p = wslab_ref[W_IH0:W_IH0 + C_OUT, :]             # (C_OUT, 3*GATE)
    b_gi0 = wslab_ref[BIASW:BIASW + 1, :]                  # (1, 3*GATE)
    b_gi1b = jnp.broadcast_to(wslab_ref[BIASW + 1:BIASW + 2, :], (B, 3 * GATE))
    b_hn0b = jnp.broadcast_to(wslab_ref[BIASW + 2:BIASW + 3, 0:GATE], (B, GATE))
    b_hn1b = jnp.broadcast_to(wslab_ref[BIASW + 3:BIASW + 4, 0:GATE], (B, GATE))

    conv_w = nslab_ref[N_CONV_W:N_CONV_W + K * C_IN, 0:C_OUT]   # (K*C_IN, C_OUT)
    conv_b = nslab_ref[N_BIAS:N_BIAS + 1, 0:C_OUT]              # (1, C_OUT)
    w1_seq = nslab_ref[N_W1_SEQ:N_W1_SEQ + H, 0:FC_HID]         # (H, FC_HID)
    w1_st = nslab_ref[N_W1_ST:N_W1_ST + S_DIM, 0:FC_HID]        # (S_DIM, FC_HID)
    b_fc1 = nslab_ref[N_BIAS + 1:N_BIAS + 2, 0:FC_HID]          # (1, FC_HID)
    w2p = nslab_ref[N_W2:N_W2 + FC_HID, :]                      # (FC_HID, 128)
    b2p = nslab_ref[N_BIAS + 2:N_BIAS + 3, :]                   # (1, 128)

    # ---- Conv1d (im2col, single matmul) + SiLU --------------------------------
    conv_all = _silu(
        jnp.dot(act_ref[:, 0:K * C_IN], conv_w, preferred_element_type=jnp.float32)
        + conv_b)                                               # (L*B, C_OUT)

    # ---- layer-0 input projections for ALL steps (hoisted out of recurrence) --
    gi0_all = jnp.dot(conv_all, w_ih0p, preferred_element_type=jnp.float32) + b_gi0

    # ---- skewed two-layer GRU recurrence --------------------------------------
    h0 = jnp.zeros((B, H), jnp.float32)
    h1 = jnp.zeros((B, H), jnp.float32)
    for t in range(L):
        # one fused MXU push: gh0 (layer-0 hidden gates) + gi1 (layer-1 input gates)
        cat = jnp.dot(h0, w_cat, preferred_element_type=jnp.float32)   # (B, 6*GATE)
        gh0 = cat[:, 0:3 * GATE]
        if t >= 1:                         # layer-1 step t-1 (consumes h0_{t-1})
            gi1 = cat[:, 3 * GATE:6 * GATE] + b_gi1b
            gh1 = jnp.dot(h1, w_hh1p, preferred_element_type=jnp.float32)
            h1 = _cell(gi1, gh1, h1, b_hn1b)
        h0 = _cell(gi0_all[t * B:(t + 1) * B, :], gh0, h0, b_hn0b)      # h0_t
    # final layer-1 step consumes h0_{L-1}
    gi1 = jnp.dot(h0, w_ih1p, preferred_element_type=jnp.float32) + b_gi1b
    gh1 = jnp.dot(h1, w_hh1p, preferred_element_type=jnp.float32)
    h1 = _cell(gi1, gh1, h1, b_hn1b)                                    # == h_n[-1]

    # ---- head: fc1(concat([...])) as split matmuls + SiLU + fc2 ---------------
    pre = (jnp.dot(h1, w1_seq, preferred_element_type=jnp.float32)
           + jnp.dot(act_ref[0:B, K * C_IN:K * C_IN + S_DIM], w1_st,
                     preferred_element_type=jnp.float32)
           + emb_ref[...]
           + b_fc1)
    hid = _silu(pre)
    # TODO(synk): nn.Dropout omitted (inference mode -> identity).
    out_ref[...] = jnp.dot(hid, w2p, preferred_element_type=jnp.float32) + b2p


# ------------------------------ parameter packing -----------------------------
def _pad_gates(w3):
    """(3, in, H) gate-major weights -> (in, 3*GATE), gate g at lanes [g*GATE:g*GATE+H]."""
    in_dim = w3.shape[1]
    out = jnp.zeros((in_dim, 3 * GATE), jnp.float32)
    for g in range(3):
        out = out.at[:, g * GATE:g * GATE + H].set(w3[g].astype(jnp.float32))
    return out


def _pad_gate_bias(rows):
    """list of 3 (1,H) bias rows -> (1, 3*GATE)."""
    out = jnp.zeros((1, 3 * GATE), jnp.float32)
    for g in range(3):
        out = out.at[:, g * GATE:g * GATE + H].set(rows[g].astype(jnp.float32))
    return out


def pack_params(params):
    """Pre-fuse / pre-pad the original-layout params into the two slabs."""
    (conv_w, conv_b, w_ih0, w_hh0, b_ih0, b_hh0, w_ih1, w_hh1, b_ih1, b_hh1,
     ru_tab, mo_tab, w1_seq, w1_ru, w1_mo, w1_st, b1, w2, b2) = params

    wslab = jnp.zeros((WIDE_ROWS, 3 * GATE), jnp.float32)
    wslab = wslab.at[W_HH0:W_HH0 + H, :].set(_pad_gates(w_hh0))
    wslab = wslab.at[W_IH1:W_IH1 + H, :].set(_pad_gates(w_ih1))
    wslab = wslab.at[W_HH1:W_HH1 + H, :].set(_pad_gates(w_hh1))
    wslab = wslab.at[W_IH0:W_IH0 + C_OUT, :].set(_pad_gates(w_ih0))
    # r/z gates: b_ih + b_hh folded; n gate: b_ih only (b_hh_n stays inside r*(...))
    wslab = wslab.at[BIASW:BIASW + 1, :].set(
        _pad_gate_bias([b_ih0[0] + b_hh0[0], b_ih0[1] + b_hh0[1], b_ih0[2]]))
    wslab = wslab.at[BIASW + 1:BIASW + 2, :].set(
        _pad_gate_bias([b_ih1[0] + b_hh1[0], b_ih1[1] + b_hh1[1], b_ih1[2]]))
    wslab = wslab.at[BIASW + 2:BIASW + 3, 0:H].set(b_hh0[2].astype(jnp.float32))
    wslab = wslab.at[BIASW + 3:BIASW + 4, 0:H].set(b_hh1[2].astype(jnp.float32))

    nslab = jnp.zeros((NARROW_ROWS, 128), jnp.float32)
    nslab = nslab.at[N_CONV_W:N_CONV_W + K * C_IN, 0:C_OUT].set(
        conv_w.reshape(K * C_IN, C_OUT).astype(jnp.float32))
    nslab = nslab.at[N_RU_FC:N_RU_FC + RU_NUM, 0:FC_HID].set(
        (ru_tab @ w1_ru).astype(jnp.float32))          # embedding folded through fc1
    nslab = nslab.at[N_MO_FC:N_MO_FC + MO_NUM, 0:FC_HID].set(
        (mo_tab @ w1_mo).astype(jnp.float32))
    nslab = nslab.at[N_W1_SEQ:N_W1_SEQ + H, 0:FC_HID].set(w1_seq.astype(jnp.float32))
    nslab = nslab.at[N_W1_ST:N_W1_ST + S_DIM, 0:FC_HID].set(w1_st.astype(jnp.float32))
    nslab = nslab.at[N_W2:N_W2 + FC_HID, 0:1].set(w2.astype(jnp.float32))
    nslab = nslab.at[N_BIAS:N_BIAS + 1, 0:C_OUT].set(conv_b.astype(jnp.float32))
    nslab = nslab.at[N_BIAS + 1:N_BIAS + 2, 0:FC_HID].set(b1.astype(jnp.float32))
    nslab = nslab.at[N_BIAS + 2, 0].set(b2[0, 0].astype(jnp.float32))
    return nslab, wslab


# ------------------------------ wrapper ---------------------------------------
def _model_forward(x_seq, x_static, ru_idx, mo_idx, nslab, wslab):
    """x_seq: (B,T,C_IN), x_static: (B,S_DIM), ru_idx/mo_idx: (B,) int.  Returns (B,)."""
    x32 = x_seq.astype(jnp.float32)
    # im2col (layout plumbing only): rows t-major, b-minor; cols (K, C_IN) flattened.
    windows = jnp.stack([x32[:, t:t + K, :].reshape(B, K * C_IN) for t in range(L)],
                        axis=0)
    x_im2col = windows.reshape(L * B, K * C_IN)

    # single packed activation block: im2col in cols [0:K*C_IN], x_static in cols [K*C_IN:]
    act = jnp.zeros((L * B, ACT_COLS), jnp.float32)
    act = act.at[:, 0:K * C_IN].set(x_im2col)
    act = act.at[0:B, K * C_IN:].set(x_static.astype(jnp.float32))

    # clamp indices (Pallas does no OOB check on VMEM refs)
    idx = jnp.concatenate([jnp.clip(ru_idx.astype(jnp.int32), 0, RU_NUM - 1),
                           jnp.clip(mo_idx.astype(jnp.int32), 0, MO_NUM - 1)])

    smem = pl.BlockSpec(memory_space=pltpu.MemorySpace.SMEM)
    vmem = pl.BlockSpec(memory_space=pltpu.MemorySpace.VMEM)
    out = pl.pallas_call(
        cnn_gru_energy_kernel,
        out_shape=jax.ShapeDtypeStruct((B, 128), jnp.float32),
        in_specs=[smem, vmem, vmem, vmem],
        out_specs=vmem,
        scratch_shapes=[pltpu.VMEM((B, FC_HID), jnp.float32)],
    )(idx, act, nslab, wslab)
    return out[:, 0]                                   # lane-dense out; wrapper slices


model_forward = jax.jit(_model_forward)


# --------------------------- parameter initialization -------------------------
def init_params(key):
    keys = iter(jax.random.split(key, 20))

    def u(shape, scale):
        return jax.random.uniform(next(keys), shape, jnp.float32, -scale, scale)

    conv_w = u((K, C_IN, C_OUT), 0.3)       # torch Conv1d weight (C_OUT,C_IN,K), pre-transposed
    conv_b = u((1, C_OUT), 0.3)
    w_ih0 = u((3, C_OUT, H), 0.25)          # torch weight_ih_l0 (3H,C_OUT), gate-major + transposed
    w_hh0 = u((3, H, H), 0.25)
    b_ih0 = u((3, 1, H), 0.25)
    b_hh0 = u((3, 1, H), 0.25)
    w_ih1 = u((3, H, H), 0.25)
    w_hh1 = u((3, H, H), 0.25)
    b_ih1 = u((3, 1, H), 0.25)
    b_hh1 = u((3, 1, H), 0.25)
    ru_tab = jax.random.normal(next(keys), (RU_NUM, RU_DIM), jnp.float32)
    mo_tab = jax.random.normal(next(keys), (MO_NUM, MO_DIM), jnp.float32)
    w1_seq = u((H, FC_HID), 0.15)           # fc1 weight split along its input dim, transposed
    w1_ru = u((RU_DIM, FC_HID), 0.15)
    w1_mo = u((MO_DIM, FC_HID), 0.15)
    w1_st = u((S_DIM, FC_HID), 0.15)
    b1 = u((1, FC_HID), 0.15)
    w2 = u((FC_HID, 1), 0.15)
    b2 = u((1, 1), 0.15)
    return (conv_w, conv_b, w_ih0, w_hh0, b_ih0, b_hh0, w_ih1, w_hh1, b_ih1, b_hh1,
            ru_tab, mo_tab, w1_seq, w1_ru, w1_mo, w1_st, b1, w2, b2)


# ------------------------------ pure-JAX reference ----------------------------
def reference_forward(x_seq, x_static, ru_idx, mo_idx, params):
    (conv_w, conv_b, w_ih0, w_hh0, b_ih0, b_hh0, w_ih1, w_hh1, b_ih1, b_hh1,
     ru_tab, mo_tab, w1_seq, w1_ru, w1_mo, w1_st, b1, w2, b2) = params

    def cell(x_t, h, w_ih, w_hh, b_ih, b_hh):
        gi = [x_t @ w_ih[g] + b_ih[g] for g in range(3)]
        gh = [h @ w_hh[g] + b_hh[g] for g in range(3)]
        r = jax.nn.sigmoid(gi[0] + gh[0])
        z = jax.nn.sigmoid(gi[1] + gh[1])
        n = jnp.tanh(gi[2] + r * gh[2])
        return (1.0 - z) * n + z * h

    h0 = jnp.zeros((B, H), jnp.float32)
    outs0 = []
    for t in range(L):
        c_t = conv_b[0] + sum(x_seq[:, t + dk, :] @ conv_w[dk] for dk in range(K))
        c_t = c_t * jax.nn.sigmoid(c_t)
        h0 = cell(c_t, h0, w_ih0, w_hh0, b_ih0, b_hh0)
        outs0.append(h0)
    h1 = jnp.zeros((B, H), jnp.float32)
    for t in range(L):
        h1 = cell(outs0[t], h1, w_ih1, w_hh1, b_ih1, b_hh1)

    ru_vec = ru_tab[ru_idx]
    mo_vec = mo_tab[mo_idx]
    h = h1 @ w1_seq + ru_vec @ w1_ru + mo_vec @ w1_mo + x_static @ w1_st + b1
    h = h * jax.nn.sigmoid(h)
    out = h @ w2 + b2
    return out[:, 0]


if __name__ == "__main__":
    key = jax.random.PRNGKey(0)
    k1, k2, k3, k4, kp = jax.random.split(key, 5)
    x_seq = jax.random.normal(k1, (B, T, C_IN), jnp.float32)
    x_static = jax.random.normal(k2, (B, S_DIM), jnp.float32)
    ru_idx = jax.random.randint(k3, (B,), 0, RU_NUM)
    mo_idx = jax.random.randint(k4, (B,), 0, MO_NUM)
    params = init_params(kp)
    nslab, wslab = pack_params(params)

    out = model_forward(x_seq, x_static, ru_idx, mo_idx, nslab, wslab)
    out = jax.block_until_ready(out)
    assert out.shape == (B,)

    ref = reference_forward(x_seq, x_static, ru_idx, mo_idx, params)
    np.testing.assert_allclose(np.asarray(out), np.asarray(ref), rtol=1e-3, atol=1e-3)
    print("KERNEL_OK")
</pallas_src>

<mosaic_0001>
module attributes {stable_mosaic.version = 11 : i64} {
  func.func @cnn_gru_energy_kernel(%arg0: memref<4xi32, #tpu.memory_space<smem>>, %arg1: memref<12x16xf32, #tpu.memory_space<vmem>>, %arg2: memref<112x128xf32, #tpu.memory_space<vmem>>, %arg3: memref<64x384xf32, #tpu.memory_space<vmem>>, %arg4: memref<2x128xf32, #tpu.memory_space<vmem>>, %arg5: memref<2x32xf32, #tpu.memory_space<vmem>>) attributes {dimension_semantics = [], scalar_prefetch = 0 : i64, scratch_operands = 1 : i64, tpu.core_type = #tpu.core_type<tc>} {
    %c0 = arith.constant 0 : index
    %0 = memref.load %arg0[%c0] : memref<4xi32, #tpu.memory_space<smem>>
    %c2 = arith.constant 2 : index
    %1 = memref.load %arg0[%c2] : memref<4xi32, #tpu.memory_space<smem>>
    %c16_i32 = arith.constant 16 : i32
    %2 = arith.addi %c16_i32, %0 : i32
    %3 = arith.index_cast %2 : i32 to index
    %c0_0 = arith.constant 0 : index
    %4 = vector.load %arg2[%3, %c0_0] : memref<112x128xf32, #tpu.memory_space<vmem>>, vector<1x32xf32>
    %c32_i32 = arith.constant 32 : i32
    %5 = arith.addi %c32_i32, %1 : i32
    %6 = arith.index_cast %5 : i32 to index
    %c0_1 = arith.constant 0 : index
    %7 = vector.load %arg2[%6, %c0_1] : memref<112x128xf32, #tpu.memory_space<vmem>>, vector<1x32xf32>
    %8 = arith.addf %4, %7 : vector<1x32xf32>
    %c0_2 = arith.constant 0 : index
    %c0_3 = arith.constant 0 : index
    %9 = vector.load %arg5[%c0_2, %c0_3] : memref<2x32xf32, #tpu.memory_space<vmem>>, vector<1x32xf32>
    tpu.vector_store %arg5[%c0_2, %c0_3], %8 {strides = array<i32>} : memref<2x32xf32, #tpu.memory_space<vmem>>, vector<1x32xf32>,
    %c1 = arith.constant 1 : index
    %10 = memref.load %arg0[%c1] : memref<4xi32, #tpu.memory_space<smem>>
    %c3 = arith.constant 3 : index
    %11 = memref.load %arg0[%c3] : memref<4xi32, #tpu.memory_space<smem>>
    %c16_i32_4 = arith.constant 16 : i32
    %12 = arith.addi %c16_i32_4, %10 : i32
    %13 = arith.index_cast %12 : i32 to index
    %c0_5 = arith.constant 0 : index
    %14 = vector.load %arg2[%13, %c0_5] : memref<112x128xf32, #tpu.memory_space<vmem>>, vector<1x32xf32>
    %c32_i32_6 = arith.constant 32 : i32
    %15 = arith.addi %c32_i32_6, %11 : i32
    %16 = arith.index_cast %15 : i32 to index
    %c0_7 = arith.constant 0 : index
    %17 = vector.load %arg2[%16, %c0_7] : memref<112x128xf32, #tpu.memory_space<vmem>>, vector<1x32xf32>
    %18 = arith.addf %14, %17 : vector<1x32xf32>
    %c1_8 = arith.constant 1 : index
    %c0_9 = arith.constant 0 : index
    %19 = vector.load %arg5[%c1_8, %c0_9] : memref<2x32xf32, #tpu.memory_space<vmem>>, vector<1x32xf32>
    tpu.vector_store %arg5[%c1_8, %c0_9], %18 {strides = array<i32>} : memref<2x32xf32, #tpu.memory_space<vmem>>, vector<1x32xf32>,
    %c0_10 = arith.constant 0 : index
    %c0_11 = arith.constant 0 : index
    %20 = vector.load %arg3[%c0_10, %c0_11] : memref<64x384xf32, #tpu.memory_space<vmem>>, vector<16x384xf32>
    %c16 = arith.constant 16 : index
    %c0_12 = arith.constant 0 : index
    %21 = vector.load %arg3[%c16, %c0_12] : memref<64x384xf32, #tpu.memory_space<vmem>>, vector<16x384xf32>
    %22 = tpu.concatenate %20, %21 in 1 : vector<16x384xf32>, vector<16x384xf32> -> vector<16x768xf32>
    %c32 = arith.constant 32 : index
    %c0_13 = arith.constant 0 : index
    %23 = vector.load %arg3[%c32, %c0_13] : memref<64x384xf32, #tpu.memory_space<vmem>>, vector<16x384xf32>
    %c48 = arith.constant 48 : index
    %c0_14 = arith.constant 0 : index
    %24 = vector.load %arg3[%c48, %c0_14] : memref<64x384xf32, #tpu.memory_space<vmem>>, vector<8x384xf32>
    %c56 = arith.constant 56 : index
    %c0_15 = arith.constant 0 : index
    %25 = vector.load %arg3[%c56, %c0_15] : memref<64x384xf32, #tpu.memory_space<vmem>>, vector<1x384xf32>
    %c57 = arith.constant 57 : index
    %c0_16 = arith.constant 0 : index
    %26 = vector.load %arg3[%c57, %c0_16] : memref<64x384xf32, #tpu.memory_space<vmem>>, vector<1x384xf32>
    %27 = vector.shape_cast %26 : vector<1x384xf32> to vector<1x384xf32>
    %28 = vector.broadcast %27 : vector<1x384xf32> to vector<2x384xf32>
    %c58 = arith.constant 58 : index
    %c0_17 = arith.constant 0 : index
    %29 = vector.load %arg3[%c58, %c0_17] : memref<64x384xf32, #tpu.memory_space<vmem>>, vector<1x128xf32>
    %30 = vector.shape_cast %29 : vector<1x128xf32> to vector<1x128xf32>
    %31 = vector.broadcast %30 : vector<1x128xf32> to vector<2x128xf32>
    %c59 = arith.constant 59 : index
    %c0_18 = arith.constant 0 : index
    %32 = vector.load %arg3[%c59, %c0_18] : memref<64x384xf32, #tpu.memory_space<vmem>>, vector<1x128xf32>
    %33 = vector.shape_cast %32 : vector<1x128xf32> to vector<1x128xf32>
    %34 = vector.broadcast %33 : vector<1x128xf32> to vector<2x128xf32>
    %c0_19 = arith.constant 0 : index
    %c0_20 = arith.constant 0 : index
    %35 = vector.load %arg2[%c0_19, %c0_20] : memref<112x128xf32, #tpu.memory_space<vmem>>, vector<12x8xf32>
    %c104 = arith.constant 104 : index
    %c0_21 = arith.constant 0 : index
    %36 = vector.load %arg2[%c104, %c0_21] : memref<112x128xf32, #tpu.memory_space<vmem>>, vector<1x8xf32>
    %c48_22 = arith.constant 48 : index
    %c0_23 = arith.constant 0 : index
    %37 = vector.load %arg2[%c48_22, %c0_23] : memref<112x128xf32, #tpu.memory_space<vmem>>, vector<16x32xf32>
    %c64 = arith.constant 64 : index
    %c0_24 = arith.constant 0 : index
    %38 = vector.load %arg2[%c64, %c0_24] : memref<112x128xf32, #tpu.memory_space<vmem>>, vector<4x32xf32>
    %c105 = arith.constant 105 : index
    %c0_25 = arith.constant 0 : index
    %39 = vector.load %arg2[%c105, %c0_25] : memref<112x128xf32, #tpu.memory_space<vmem>>, vector<1x32xf32>
    %c72 = arith.constant 72 : index
    %c0_26 = arith.constant 0 : index
    %40 = vector.load %arg2[%c72, %c0_26] : memref<112x128xf32, #tpu.memory_space<vmem>>, vector<32x128xf32>
    %c106 = arith.constant 106 : index
    %c0_27 = arith.constant 0 : index
    %41 = vector.load %arg2[%c106, %c0_27] : memref<112x128xf32, #tpu.memory_space<vmem>>, vector<1x128xf32>
    %c0_28 = arith.constant 0 : index
    %c0_29 = arith.constant 0 : index
    %42 = vector.load %arg1[%c0_28, %c0_29] : memref<12x16xf32, #tpu.memory_space<vmem>>, vector<12x12xf32>
    %cst = arith.constant dense<0.000000e+00> : vector<12x8xf32>
    %43 = tpu.matmul %42, %35, %cst {dimension_numbers = #tpu.dot_dimension_numbers<[1], [0], [0], [1], [0, 0, 1, 1], [], []>} : vector<12x12xf32>, vector<12x8xf32>, vector<12x8xf32> -> vector<12x8xf32>
    %44 = vector.broadcast %36 : vector<1x8xf32> to vector<12x8xf32>
    %45 = arith.addf %43, %44 : vector<12x8xf32>
    %cst_30 = arith.constant 5.000000e-01 : f32
    %46 = vector.broadcast %cst_30 : f32 to vector<12x8xf32>
    %47 = arith.mulf %46, %45 : vector<12x8xf32>
    %48 = math.tanh %47 : vector<12x8xf32>
    %cst_31 = arith.constant 1.000000e+00 : f32
    %49 = vector.broadcast %cst_31 : f32 to vector<12x8xf32>
    %50 = arith.addf %48, %49 : vector<12x8xf32>
    %cst_32 = arith.constant 5.000000e-01 : f32
    %51 = vector.broadcast %cst_32 : f32 to vector<12x8xf32>
    %52 = arith.mulf %51, %50 : vector<12x8xf32>
    %53 = arith.mulf %45, %52 : vector<12x8xf32>
    %cst_33 = arith.constant dense<0.000000e+00> : vector<12x384xf32>
    %54 = tpu.matmul %53, %24, %cst_33 {dimension_numbers = #tpu.dot_dimension_numbers<[1], [0], [0], [1], [0, 0, 1, 1], [], []>} : vector<12x8xf32>, vector<8x384xf32>, vector<12x384xf32> -> vector<12x384xf32>
    %55 = vector.broadcast %25 : vector<1x384xf32> to vector<12x384xf32>
    %56 = arith.addf %54, %55 : vector<12x384xf32>
    %cst_34 = arith.constant 0.000000e+00 : f32
    %57 = vector.broadcast %cst_34 : f32 to vector<2x16xf32>
    %cst_35 = arith.constant 0.000000e+00 : f32
    %58 = vector.broadcast %cst_35 : f32 to vector<2x16xf32>
    %cst_36 = arith.constant dense<0.000000e+00> : vector<2x768xf32>
    %59 = tpu.matmul %57, %22, %cst_36 {dimension_numbers = #tpu.dot_dimension_numbers<[1], [0], [0], [1], [0, 0, 1, 1], [], []>} : vector<2x16xf32>, vector<16x768xf32>, vector<2x768xf32> -> vector<2x768xf32>
    %60 = vector.extract_strided_slice %59 {offsets = [0, 0], sizes = [2, 384], strides = [1, 1]} : vector<2x768xf32> to vector<2x384xf32>
    %61 = vector.extract_strided_slice %56 {offsets = [0, 0], sizes = [2, 384], strides = [1, 1]} : vector<12x384xf32> to vector<2x384xf32>
    %62 = vector.extract_strided_slice %61 {offsets = [0, 0], sizes = [2, 128], strides = [1, 1]} : vector<2x384xf32> to vector<2x128xf32>
    %63 = vector.extract_strided_slice %60 {offsets = [0, 0], sizes = [2, 128], strides = [1, 1]} : vector<2x384xf32> to vector<2x128xf32>
    %64 = arith.addf %62, %63 : vector<2x128xf32>
    %cst_37 = arith.constant 5.000000e-01 : f32
    %65 = vector.broadcast %cst_37 : f32 to vector<2x128xf32>
    %66 = arith.mulf %65, %64 : vector<2x128xf32>
    %67 = math.tanh %66 : vector<2x128xf32>
    %cst_38 = arith.constant 1.000000e+00 : f32
    %68 = vector.broadcast %cst_38 : f32 to vector<2x128xf32>
    %69 = arith.addf %67, %68 : vector<2x128xf32>
    %cst_39 = arith.constant 5.000000e-01 : f32
    %70 = vector.broadcast %cst_39 : f32 to vector<2x128xf32>
    %71 = arith.mulf %70, %69 : vector<2x128xf32>
    %72 = vector.extract_strided_slice %61 {offsets = [0, 128], sizes = [2, 128], strides = [1, 1]} : vector<2x384xf32> to vector<2x128xf32>
    %73 = vector.extract_strided_slice %60 {offsets = [0, 128], sizes = [2, 128], strides = [1, 1]} : vector<2x384xf32> to vector<2x128xf32>
    %74 = arith.addf %72, %73 : vector<2x128xf32>
    %cst_40 = arith.constant 5.000000e-01 : f32
    %75 = vector.broadcast %cst_40 : f32 to vector<2x128xf32>
    %76 = arith.mulf %75, %74 : vector<2x128xf32>
    %77 = math.tanh %76 : vector<2x128xf32>
    %cst_41 = arith.constant 1.000000e+00 : f32
    %78 = vector.broadcast %cst_41 : f32 to vector<2x128xf32>
    %79 = arith.addf %77, %78 : vector<2x128xf32>
    %cst_42 = arith.constant 5.000000e-01 : f32
    %80 = vector.broadcast %cst_42 : f32 to vector<2x128xf32>
    %81 = arith.mulf %80, %79 : vector<2x128xf32>
    %82 = vector.extract_strided_slice %61 {offsets = [0, 256], sizes = [2, 128], strides = [1, 1]} : vector<2x384xf32> to vector<2x128xf32>
    %83 = vector.extract_strided_slice %60 {offsets = [0, 256], sizes = [2, 128], strides = [1, 1]} : vector<2x384xf32> to vector<2x128xf32>
    %84 = arith.addf %83, %31 : vector<2x128xf32>
    %85 = arith.mulf %71, %84 : vector<2x128xf32>
    %86 = arith.addf %82, %85 : vector<2x128xf32>
    %87 = math.tanh %86 : vector<2x128xf32>
    %88 = vector.extract_strided_slice %81 {offsets = [0, 0], sizes = [2, 16], strides = [1, 1]} : vector<2x128xf32> to vector<2x16xf32>
    %89 = vector.extract_strided_slice %87 {offsets = [0, 0], sizes = [2, 16], strides = [1, 1]} : vector<2x128xf32> to vector<2x16xf32>
    %cst_43 = arith.constant 1.000000e+00 : f32
    %90 = vector.broadcast %cst_43 : f32 to vector<2x16xf32>
    %91 = arith.subf %90, %88 : vector<2x16xf32>
    %92 = arith.mulf %91, %89 : vector<2x16xf32>
    %93 = arith.mulf %88, %57 : vector<2x16xf32>
    %94 = arith.addf %92, %93 : vector<2x16xf32>
    %cst_44 = arith.constant dense<0.000000e+00> : vector<2x768xf32>
    %95 = tpu.matmul %94, %22, %cst_44 {dimension_numbers = #tpu.dot_dimension_numbers<[1], [0], [0], [1], [0, 0, 1, 1], [], []>} : vector<2x16xf32>, vector<16x768xf32>, vector<2x768xf32> -> vector<2x768xf32>
    %96 = vector.extract_strided_slice %95 {offsets = [0, 0], sizes = [2, 384], strides = [1, 1]} : vector<2x768xf32> to vector<2x384xf32>
    %97 = vector.extract_strided_slice %95 {offsets = [0, 384], sizes = [2, 384], strides = [1, 1]} : vector<2x768xf32> to vector<2x384xf32>
    %98 = arith.addf %97, %28 : vector<2x384xf32>
    %cst_45 = arith.constant dense<0.000000e+00> : vector<2x384xf32>
    %99 = tpu.matmul %58, %23, %cst_45 {dimension_numbers = #tpu.dot_dimension_numbers<[1], [0], [0], [1], [0, 0, 1, 1], [], []>} : vector<2x16xf32>, vector<16x384xf32>, vector<2x384xf32> -> vector<2x384xf32>
    %100 = vector.extract_strided_slice %98 {offsets = [0, 0], sizes = [2, 128], strides = [1, 1]} : vector<2x384xf32> to vector<2x128xf32>
    %101 = vector.extract_strided_slice %99 {offsets = [0, 0], sizes = [2, 128], strides = [1, 1]} : vector<2x384xf32> to vector<2x128xf32>
    %102 = arith.addf %100, %101 : vector<2x128xf32>
    %cst_46 = arith.constant 5.000000e-01 : f32
    %103 = vector.broadcast %cst_46 : f32 to vector<2x128xf32>
    %104 = arith.mulf %103, %102 : vector<2x128xf32>
    %105 = math.tanh %104 : vector<2x128xf32>
    %cst_47 = arith.constant 1.000000e+00 : f32
    %106 = vector.broadcast %cst_47 : f32 to vector<2x128xf32>
    %107 = arith.addf %105, %106 : vector<2x128xf32>
    %cst_48 = arith.constant 5.000000e-01 : f32
    %108 = vector.broadcast %cst_48 : f32 to vector<2x128xf32>
    %109 = arith.mulf %108, %107 : vector<2x128xf32>
    %110 = vector.extract_strided_slice %98 {offsets = [0, 128], sizes = [2, 128], strides = [1, 1]} : vector<2x384xf32> to vector<2x128xf32>
    %111 = vector.extract_strided_slice %99 {offsets = [0, 128], sizes = [2, 128], strides = [1, 1]} : vector<2x384xf32> to vector<2x128xf32>
    %112 = arith.addf %110, %111 : vector<2x128xf32>
    %cst_49 = arith.constant 5.000000e-01 : f32
    %113 = vector.broadcast %cst_49 : f32 to vector<2x128xf32>
    %114 = arith.mulf %113, %112 : vector<2x128xf32>
    %115 = math.tanh %114 : vector<2x128xf32>
    %cst_50 = arith.constant 1.000000e+00 : f32
    %116 = vector.broadcast %cst_50 : f32 to vector<2x128xf32>
    %117 = arith.addf %115, %116 : vector<2x128xf32>
    %cst_51 = arith.constant 5.000000e-01 : f32
    %118 = vector.broadcast %cst_51 : f32 to vector<2x128xf32>
    %119 = arith.mulf %118, %117 : vector<2x128xf32>
    %120 = vector.extract_strided_slice %98 {offsets = [0, 256], sizes = [2, 128], strides = [1, 1]} : vector<2x384xf32> to vector<2x128xf32>
    %121 = vector.extract_strided_slice %99 {offsets = [0, 256], sizes = [2, 128], strides = [1, 1]} : vector<2x384xf32> to vector<2x128xf32>
    %122 = arith.addf %121, %34 : vector<2x128xf32>
    %123 = arith.mulf %109, %122 : vector<2x128xf32>
    %124 = arith.addf %120, %123 : vector<2x128xf32>
    %125 = math.tanh %124 : vector<2x128xf32>
    %126 = vector.extract_strided_slice %119 {offsets = [0, 0], sizes = [2, 16], strides = [1, 1]} : vector<2x128xf32> to vector<2x16xf32>
    %127 = vector.extract_strided_slice %125 {offsets = [0, 0], sizes = [2, 16], strides = [1, 1]} : vector<2x128xf32> to vector<2x16xf32>
    %cst_52 = arith.constant 1.000000e+00 : f32
    %128 = vector.broadcast %cst_52 : f32 to vector<2x16xf32>
    %129 = arith.subf %128, %126 : vector<2x16xf32>
    %130 = arith.mulf %129, %127 : vector<2x16xf32>
    %131 = arith.mulf %126, %58 : vector<2x16xf32>
    %132 = arith.addf %130, %131 : vector<2x16xf32>
    %133 = vector.extract_strided_slice %56 {offsets = [2, 0], sizes = [2, 384], strides = [1, 1]} : vector<12x384xf32> to vector<2x384xf32>
    %134 = vector.extract_strided_slice %133 {offsets = [0, 0], sizes = [2, 128], strides = [1, 1]} : vector<2x384xf32> to vector<2x128xf32>
    %135 = vector.extract_strided_slice %96 {offsets = [0, 0], sizes = [2, 128], strides = [1, 1]} : vector<2x384xf32> to vector<2x128xf32>
    %136 = arith.addf %134, %135 : vector<2x128xf32>
    %cst_53 = arith.constant 5.000000e-01 : f32
    %137 = vector.broadcast %cst_53 : f32 to vector<2x128xf32>
    %138 = arith.mulf %137, %136 : vector<2x128xf32>
    %139 = math.tanh %138 : vector<2x128xf32>
    %cst_54 = arith.constant 1.000000e+00 : f32
    %140 = vector.broadcast %cst_54 : f32 to vector<2x128xf32>
    %141 = arith.addf %139, %140 : vector<2x128xf32>
    %cst_55 = arith.constant 5.000000e-01 : f32
    %142 = vector.broadcast %cst_55 : f32 to vector<2x128xf32>
    %143 = arith.mulf %142, %141 : vector<2x128xf32>
    %144 = vector.extract_strided_slice %133 {offsets = [0, 128], sizes = [2, 128], strides = [1, 1]} : vector<2x384xf32> to vector<2x128xf32>
    %145 = vector.extract_strided_slice %96 {offsets = [0, 128], sizes = [2, 128], strides = [1, 1]} : vector<2x384xf32> to vector<2x128xf32>
    %146 = arith.addf %144, %145 : vector<2x128xf32>
    %cst_56 = arith.constant 5.000000e-01 : f32
    %147 = vector.broadcast %cst_56 : f32 to vector<2x128xf32>
    %148 = arith.mulf %147, %146 : vector<2x128xf32>
    %149 = math.tanh %148 : vector<2x128xf32>
    %cst_57 = arith.constant 1.000000e+00 : f32
    %150 = vector.broadcast %cst_57 : f32 to vector<2x128xf32>
    %151 = arith.addf %149, %150 : vector<2x128xf32>
    %cst_58 = arith.constant 5.000000e-01 : f32
    %152 = vector.broadcast %cst_58 : f32 to vector<2x128xf32>
    %153 = arith.mulf %152, %151 : vector<2x128xf32>
    %154 = vector.extract_strided_slice %133 {offsets = [0, 256], sizes = [2, 128], strides = [1, 1]} : vector<2x384xf32> to vector<2x128xf32>
    %155 = vector.extract_strided_slice %96 {offsets = [0, 256], sizes = [2, 128], strides = [1, 1]} : vector<2x384xf32> to vector<2x128xf32>
    %156 = arith.addf %155, %31 : vector<2x128xf32>
    %157 = arith.mulf %143, %156 : vector<2x128xf32>
    %158 = arith.addf %154, %157 : vector<2x128xf32>
    %159 = math.tanh %158 : vector<2x128xf32>
    %160 = vector.extract_strided_slice %153 {offsets = [0, 0], sizes = [2, 16], strides = [1, 1]} : vector<2x128xf32> to vector<2x16xf32>
    %161 = vector.extract_strided_slice %159 {offsets = [0, 0], sizes = [2, 16], strides = [1, 1]} : vector<2x128xf32> to vector<2x16xf32>
    %cst_59 = arith.constant 1.000000e+00 : f32
    %162 = vector.broadcast %cst_59 : f32 to vector<2x16xf32>
    %163 = arith.subf %162, %160 : vector<2x16xf32>
    %164 = arith.mulf %163, %161 : vector<2x16xf32>
    %165 = arith.mulf %160, %94 : vector<2x16xf32>
    %166 = arith.addf %164, %165 : vector<2x16xf32>
    %cst_60 = arith.constant dense<0.000000e+00> : vector<2x768xf32>
    %167 = tpu.matmul %166, %22, %cst_60 {dimension_numbers = #tpu.dot_dimension_numbers<[1], [0], [0], [1], [0, 0, 1, 1], [], []>} : vector<2x16xf32>, vector<16x768xf32>, vector<2x768xf32> -> vector<2x768xf32>
    %168 = vector.extract_strided_slice %167 {offsets = [0, 0], sizes = [2, 384], strides = [1, 1]} : vector<2x768xf32> to vector<2x384xf32>
    %169 = vector.extract_strided_slice %167 {offsets = [0, 384], sizes = [2, 384], strides = [1, 1]} : vector<2x768xf32> to vector<2x384xf32>
    %170 = arith.addf %169, %28 : vector<2x384xf32>
    %cst_61 = arith.constant dense<0.000000e+00> : vector<2x384xf32>
    %171 = tpu.matmul %132, %23, %cst_61 {dimension_numbers = #tpu.dot_dimension_numbers<[1], [0], [0], [1], [0, 0, 1, 1], [], []>} : vector<2x16xf32>, vector<16x384xf32>, vector<2x384xf32> -> vector<2x384xf32>
    %172 = vector.extract_strided_slice %170 {offsets = [0, 0], sizes = [2, 128], strides = [1, 1]} : vector<2x384xf32> to vector<2x128xf32>
    %173 = vector.extract_strided_slice %171 {offsets = [0, 0], sizes = [2, 128], strides = [1, 1]} : vector<2x384xf32> to vector<2x128xf32>
    %174 = arith.addf %172, %173 : vector<2x128xf32>
    %cst_62 = arith.constant 5.000000e-01 : f32
    %175 = vector.broadcast %cst_62 : f32 to vector<2x128xf32>
    %176 = arith.mulf %175, %174 : vector<2x128xf32>
    %177 = math.tanh %176 : vector<2x128xf32>
    %cst_63 = arith.constant 1.000000e+00 : f32
    %178 = vector.broadcast %cst_63 : f32 to vector<2x128xf32>
    %179 = arith.addf %177, %178 : vector<2x128xf32>
    %cst_64 = arith.constant 5.000000e-01 : f32
    %180 = vector.broadcast %cst_64 : f32 to vector<2x128xf32>
    %181 = arith.mulf %180, %179 : vector<2x128xf32>
    %182 = vector.extract_strided_slice %170 {offsets = [0, 128], sizes = [2, 128], strides = [1, 1]} : vector<2x384xf32> to vector<2x128xf32>
    %183 = vector.extract_strided_slice %171 {offsets = [0, 128], sizes = [2, 128], strides = [1, 1]} : vector<2x384xf32> to vector<2x128xf32>
    %184 = arith.addf %182, %183 : vector<2x128xf32>
    %cst_65 = arith.constant 5.000000e-01 : f32
    %185 = vector.broadcast %cst_65 : f32 to vector<2x128xf32>
    %186 = arith.mulf %185, %184 : vector<2x128xf32>
    %187 = math.tanh %186 : vector<2x128xf32>
    %cst_66 = arith.constant 1.000000e+00 : f32
    %188 = vector.broadcast %cst_66 : f32 to vector<2x128xf32>
    %189 = arith.addf %187, %188 : vector<2x128xf32>
    %cst_67 = arith.constant 5.000000e-01 : f32
    %190 = vector.broadcast %cst_67 : f32 to vector<2x128xf32>
    %191 = arith.mulf %190, %189 : vector<2x128xf32>
    %192 = vector.extract_strided_slice %170 {offsets = [0, 256], sizes = [2, 128], strides = [1, 1]} : vector<2x384xf32> to vector<2x128xf32>
    %193 = vector.extract_strided_slice %171 {offsets = [0, 256], sizes = [2, 128], strides = [1, 1]} : vector<2x384xf32> to vector<2x128xf32>
    %194 = arith.addf %193, %34 : vector<2x128xf32>
    %195 = arith.mulf %181, %194 : vector<2x128xf32>
    %196 = arith.addf %192, %195 : vector<2x128xf32>
    %197 = math.tanh %196 : vector<2x128xf32>
    %198 = vector.extract_strided_slice %191 {offsets = [0, 0], sizes = [2, 16], strides = [1, 1]} : vector<2x128xf32> to vector<2x16xf32>
    %199 = vector.extract_strided_slice %197 {offsets = [0, 0], sizes = [2, 16], strides = [1, 1]} : vector<2x128xf32> to vector<2x16xf32>
    %cst_68 = arith.constant 1.000000e+00 : f32
    %200 = vector.broadcast %cst_68 : f32 to vector<2x16xf32>
    %201 = arith.subf %200, %198 : vector<2x16xf32>
    %202 = arith.mulf %201, %199 : vector<2x16xf32>
    %203 = arith.mulf %198, %132 : vector<2x16xf32>
    %204 = arith.addf %202, %203 : vector<2x16xf32>
    %205 = vector.extract_strided_slice %56 {offsets = [4, 0], sizes = [2, 384], strides = [1, 1]} : vector<12x384xf32> to vector<2x384xf32>
    %206 = vector.extract_strided_slice %205 {offsets = [0, 0], sizes = [2, 128], strides = [1, 1]} : vector<2x384xf32> to vector<2x128xf32>
    %207 = vector.extract_strided_slice %168 {offsets = [0, 0], sizes = [2, 128], strides = [1, 1]} : vector<2x384xf32> to vector<2x128xf32>
    %208 = arith.addf %206, %207 : vector<2x128xf32>
    %cst_69 = arith.constant 5.000000e-01 : f32
    %209 = vector.broadcast %cst_69 : f32 to vector<2x128xf32>
    %210 = arith.mulf %209, %208 : vector<2x128xf32>
    %211 = math.tanh %210 : vector<2x128xf32>
    %cst_70 = arith.constant 1.000000e+00 : f32
    %212 = vector.broadcast %cst_70 : f32 to vector<2x128xf32>
    %213 = arith.addf %211, %212 : vector<2x128xf32>
    %cst_71 = arith.constant 5.000000e-01 : f32
    %214 = vector.broadcast %cst_71 : f32 to vector<2x128xf32>
    %215 = arith.mulf %214, %213 : vector<2x128xf32>
    %216 = vector.extract_strided_slice %205 {offsets = [0, 128], sizes = [2, 128], strides = [1, 1]} : vector<2x384xf32> to vector<2x128xf32>
    %217 = vector.extract_strided_slice %168 {offsets = [0, 128], sizes = [2, 128], strides = [1, 1]} : vector<2x384xf32> to vector<2x128xf32>
    %218 = arith.addf %216, %217 : vector<2x128xf32>
    %cst_72 = arith.constant 5.000000e-01 : f32
    %219 = vector.broadcast %cst_72 : f32 to vector<2x128xf32>
    %220 = arith.mulf %219, %218 : vector<2x128xf32>
    %221 = math.tanh %220 : vector<2x128xf32>
    %cst_73 = arith.constant 1.000000e+00 : f32
    %222 = vector.broadcast %cst_73 : f32 to vector<2x128xf32>
    %223 = arith.addf %221, %222 : vector<2x128xf32>
    %cst_74 = arith.constant 5.000000e-01 : f32
    %224 = vector.broadcast %cst_74 : f32 to vector<2x128xf32>
    %225 = arith.mulf %224, %223 : vector<2x128xf32>
    %226 = vector.extract_strided_slice %205 {offsets = [0, 256], sizes = [2, 128], strides = [1, 1]} : vector<2x384xf32> to vector<2x128xf32>
    %227 = vector.extract_strided_slice %168 {offsets = [0, 256], sizes = [2, 128], strides = [1, 1]} : vector<2x384xf32> to vector<2x128xf32>
    %228 = arith.addf %227, %31 : vector<2x128xf32>
    %229 = arith.mulf %215, %228 : vector<2x128xf32>
    %230 = arith.addf %226, %229 : vector<2x128xf32>
    %231 = math.tanh %230 : vector<2x128xf32>
    %232 = vector.extract_strided_slice %225 {offsets = [0, 0], sizes = [2, 16], strides = [1, 1]} : vector<2x128xf32> to vector<2x16xf32>
    %233 = vector.extract_strided_slice %231 {offsets = [0, 0], sizes = [2, 16], strides = [1, 1]} : vector<2x128xf32> to vector<2x16xf32>
    %cst_75 = arith.constant 1.000000e+00 : f32
    %234 = vector.broadcast %cst_75 : f32 to vector<2x16xf32>
    %235 = arith.subf %234, %232 : vector<2x16xf32>
    %236 = arith.mulf %235, %233 : vector<2x16xf32>
    %237 = arith.mulf %232, %166 : vector<2x16xf32>
    %238 = arith.addf %236, %237 : vector<2x16xf32>
    %cst_76 = arith.constant dense<0.000000e+00> : vector<2x768xf32>
    %239 = tpu.matmul %238, %22, %cst_76 {dimension_numbers = #tpu.dot_dimension_numbers<[1], [0], [0], [1], [0, 0, 1, 1], [], []>} : vector<2x16xf32>, vector<16x768xf32>, vector<2x768xf32> -> vector<2x768xf32>
    %240 = vector.extract_strided_slice %239 {offsets = [0, 0], sizes = [2, 384], strides = [1, 1]} : vector<2x768xf32> to vector<2x384xf32>
    %241 = vector.extract_strided_slice %239 {offsets = [0, 384], sizes = [2, 384], strides = [1, 1]} : vector<2x768xf32> to vector<2x384xf32>
    %242 = arith.addf %241, %28 : vector<2x384xf32>
    %cst_77 = arith.constant dense<0.000000e+00> : vector<2x384xf32>
    %243 = tpu.matmul %204, %23, %cst_77 {dimension_numbers = #tpu.dot_dimension_numbers<[1], [0], [0], [1], [0, 0, 1, 1], [], []>} : vector<2x16xf32>, vector<16x384xf32>, vector<2x384xf32> -> vector<2x384xf32>
    %244 = vector.extract_strided_slice %242 {offsets = [0, 0], sizes = [2, 128], strides = [1, 1]} : vector<2x384xf32> to vector<2x128xf32>
    %245 = vector.extract_strided_slice %243 {offsets = [0, 0], sizes = [2, 128], strides = [1, 1]} : vector<2x384xf32> to vector<2x128xf32>
    %246 = arith.addf %244, %245 : vector<2x128xf32>
    %cst_78 = arith.constant 5.000000e-01 : f32
    %247 = vector.broadcast %cst_78 : f32 to vector<2x128xf32>
    %248 = arith.mulf %247, %246 : vector<2x128xf32>
    %249 = math.tanh %248 : vector<2x128xf32>
    %cst_79 = arith.constant 1.000000e+00 : f32
    %250 = vector.broadcast %cst_79 : f32 to vector<2x128xf32>
    %251 = arith.addf %249, %250 : vector<2x128xf32>
    %cst_80 = arith.constant 5.000000e-01 : f32
    %252 = vector.broadcast %cst_80 : f32 to vector<2x128xf32>
    %253 = arith.mulf %252, %251 : vector<2x128xf32>
    %254 = vector.extract_strided_slice %242 {offsets = [0, 128], sizes = [2, 128], strides = [1, 1]} : vector<2x384xf32> to vector<2x128xf32>
    %255 = vector.extract_strided_slice %243 {offsets = [0, 128], sizes = [2, 128], strides = [1, 1]} : vector<2x384xf32> to vector<2x128xf32>
    %256 = arith.addf %254, %255 : vector<2x128xf32>
    %cst_81 = arith.constant 5.000000e-01 : f32
    %257 = vector.broadcast %cst_81 : f32 to vector<2x128xf32>
    %258 = arith.mulf %257, %256 : vector<2x128xf32>
    %259 = math.tanh %258 : vector<2x128xf32>
    %cst_82 = arith.constant 1.000000e+00 : f32
    %260 = vector.broadcast %cst_82 : f32 to vector<2x128xf32>
    %261 = arith.addf %259, %260 : vector<2x128xf32>
    %cst_83 = arith.constant 5.000000e-01 : f32
    %262 = vector.broadcast %cst_83 : f32 to vector<2x128xf32>
    %263 = arith.mulf %262, %261 : vector<2x128xf32>
    %264 = vector.extract_strided_slice %242 {offsets = [0, 256], sizes = [2, 128], strides = [1, 1]} : vector<2x384xf32> to vector<2x128xf32>
    %265 = vector.extract_strided_slice %243 {offsets = [0, 256], sizes = [2, 128], strides = [1, 1]} : vector<2x384xf32> to vector<2x128xf32>
    %266 = arith.addf %265, %34 : vector<2x128xf32>
    %267 = arith.mulf %253, %266 : vector<2x128xf32>
    %268 = arith.addf %264, %267 : vector<2x128xf32>
    %269 = math.tanh %268 : vector<2x128xf32>
    %270 = vector.extract_strided_slice %263 {offsets = [0, 0], sizes = [2, 16], strides = [1, 1]} : vector<2x128xf32> to vector<2x16xf32>
    %271 = vector.extract_strided_slice %269 {offsets = [0, 0], sizes = [2, 16], strides = [1, 1]} : vector<2x128xf32> to vector<2x16xf32>
    %cst_84 = arith.constant 1.000000e+00 : f32
    %272 = vector.broadcast %cst_84 : f32 to vector<2x16xf32>
    %273 = arith.subf %272, %270 : vector<2x16xf32>
    %274 = arith.mulf %273, %271 : vector<2x16xf32>
    %275 = arith.mulf %270, %204 : vector<2x16xf32>
    %276 = arith.addf %274, %275 : vector<2x16xf32>
    %277 = vector.extract_strided_slice %56 {offsets = [6, 0], sizes = [2, 384], strides = [1, 1]} : vector<12x384xf32> to vector<2x384xf32>
    %278 = vector.extract_strided_slice %277 {offsets = [0, 0], sizes = [2, 128], strides = [1, 1]} : vector<2x384xf32> to vector<2x128xf32>
    %279 = vector.extract_strided_slice %240 {offsets = [0, 0], sizes = [2, 128], strides = [1, 1]} : vector<2x384xf32> to vector<2x128xf32>
    %280 = arith.addf %278, %279 : vector<2x128xf32>
    %cst_85 = arith.constant 5.000000e-01 : f32
    %281 = vector.broadcast %cst_85 : f32 to vector<2x128xf32>
    %282 = arith.mulf %281, %280 : vector<2x128xf32>
    %283 = math.tanh %282 : vector<2x128xf32>
    %cst_86 = arith.constant 1.000000e+00 : f32
    %284 = vector.broadcast %cst_86 : f32 to vector<2x128xf32>
    %285 = arith.addf %283, %284 : vector<2x128xf32>
    %cst_87 = arith.constant 5.000000e-01 : f32
    %286 = vector.broadcast %cst_87 : f32 to vector<2x128xf32>
    %287 = arith.mulf %286, %285 : vector<2x128xf32>
    %288 = vector.extract_strided_slice %277 {offsets = [0, 128], sizes = [2, 128], strides = [1, 1]} : vector<2x384xf32> to vector<2x128xf32>
    %289 = vector.extract_strided_slice %240 {offsets = [0, 128], sizes = [2, 128], strides = [1, 1]} : vector<2x384xf32> to vector<2x128xf32>
    %290 = arith.addf %288, %289 : vector<2x128xf32>
    %cst_88 = arith.constant 5.000000e-01 : f32
    %291 = vector.broadcast %cst_88 : f32 to vector<2x128xf32>
    %292 = arith.mulf %291, %290 : vector<2x128xf32>
    %293 = math.tanh %292 : vector<2x128xf32>
    %cst_89 = arith.constant 1.000000e+00 : f32
    %294 = vector.broadcast %cst_89 : f32 to vector<2x128xf32>
    %295 = arith.addf %293, %294 : vector<2x128xf32>
    %cst_90 = arith.constant 5.000000e-01 : f32
    %296 = vector.broadcast %cst_90 : f32 to vector<2x128xf32>
    %297 = arith.mulf %296, %295 : vector<2x128xf32>
    %298 = vector.extract_strided_slice %277 {offsets = [0, 256], sizes = [2, 128], strides = [1, 1]} : vector<2x384xf32> to vector<2x128xf32>
    %299 = vector.extract_strided_slice %240 {offsets = [0, 256], sizes = [2, 128], strides = [1, 1]} : vector<2x384xf32> to vector<2x128xf32>
    %300 = arith.addf %299, %31 : vector<2x128xf32>
    %301 = arith.mulf %287, %300 : vector<2x128xf32>
    %302 = arith.addf %298, %301 : vector<2x128xf32>
    %303 = math.tanh %302 : vector<2x128xf32>
    %304 = vector.extract_strided_slice %297 {offsets = [0, 0], sizes = [2, 16], strides = [1, 1]} : vector<2x128xf32> to vector<2x16xf32>
    %305 = vector.extract_strided_slice %303 {offsets = [0, 0], sizes = [2, 16], strides = [1, 1]} : vector<2x128xf32> to vector<2x16xf32>
    %cst_91 = arith.constant 1.000000e+00 : f32
    %306 = vector.broadcast %cst_91 : f32 to vector<2x16xf32>
    %307 = arith.subf %306, %304 : vector<2x16xf32>
    %308 = arith.mulf %307, %305 : vector<2x16xf32>
    %309 = arith.mulf %304, %238 : vector<2x16xf32>
    %310 = arith.addf %308, %309 : vector<2x16xf32>
    %cst_92 = arith.constant dense<0.000000e+00> : vector<2x768xf32>
    %311 = tpu.matmul %310, %22, %cst_92 {dimension_numbers = #tpu.dot_dimension_numbers<[1], [0], [0], [1], [0, 0, 1, 1], [], []>} : vector<2x16xf32>, vector<16x768xf32>, vector<2x768xf32> -> vector<2x768xf32>
    %312 = vector.extract_strided_slice %311 {offsets = [0, 0], sizes = [2, 384], strides = [1, 1]} : vector<2x768xf32> to vector<2x384xf32>
    %313 = vector.extract_strided_slice %311 {offsets = [0, 384], sizes = [2, 384], strides = [1, 1]} : vector<2x768xf32> to vector<2x384xf32>
    %314 = arith.addf %313, %28 : vector<2x384xf32>
    %cst_93 = arith.constant dense<0.000000e+00> : vector<2x384xf32>
    %315 = tpu.matmul %276, %23, %cst_93 {dimension_numbers = #tpu.dot_dimension_numbers<[1], [0], [0], [1], [0, 0, 1, 1], [], []>} : vector<2x16xf32>, vector<16x384xf32>, vector<2x384xf32> -> vector<2x384xf32>
    %316 = vector.extract_strided_slice %314 {offsets = [0, 0], sizes = [2, 128], strides = [1, 1]} : vector<2x384xf32> to vector<2x128xf32>
    %317 = vector.extract_strided_slice %315 {offsets = [0, 0], sizes = [2, 128], strides = [1, 1]} : vector<2x384xf32> to vector<2x128xf32>
    %318 = arith.addf %316, %317 : vector<2x128xf32>
    %cst_94 = arith.constant 5.000000e-01 : f32
    %319 = vector.broadcast %cst_94 : f32 to vector<2x128xf32>
    %320 = arith.mulf %319, %318 : vector<2x128xf32>
    %321 = math.tanh %320 : vector<2x128xf32>
    %cst_95 = arith.constant 1.000000e+00 : f32
    %322 = vector.broadcast %cst_95 : f32 to vector<2x128xf32>
    %323 = arith.addf %321, %322 : vector<2x128xf32>
    %cst_96 = arith.constant 5.000000e-01 : f32
    %324 = vector.broadcast %cst_96 : f32 to vector<2x128xf32>
    %325 = arith.mulf %324, %323 : vector<2x128xf32>
    %326 = vector.extract_strided_slice %314 {offsets = [0, 128], sizes = [2, 128], strides = [1, 1]} : vector<2x384xf32> to vector<2x128xf32>
    %327 = vector.extract_strided_slice %315 {offsets = [0, 128], sizes = [2, 128], strides = [1, 1]} : vector<2x384xf32> to vector<2x128xf32>
    %328 = arith.addf %326, %327 : vector<2x128xf32>
    %cst_97 = arith.constant 5.000000e-01 : f32
    %329 = vector.broadcast %cst_97 : f32 to vector<2x128xf32>
    %330 = arith.mulf %329, %328 : vector<2x128xf32>
    %331 = math.tanh %330 : vector<2x128xf32>
    %cst_98 = arith.constant 1.000000e+00 : f32
    %332 = vector.broadcast %cst_98 : f32 to vector<2x128xf32>
    %333 = arith.addf %331, %332 : vector<2x128xf32>
    %cst_99 = arith.constant 5.000000e-01 : f32
    %334 = vector.broadcast %cst_99 : f32 to vector<2x128xf32>
    %335 = arith.mulf %334, %333 : vector<2x128xf32>
    %336 = vector.extract_strided_slice %314 {offsets = [0, 256], sizes = [2, 128], strides = [1, 1]} : vector<2x384xf32> to vector<2x128xf32>
    %337 = vector.extract_strided_slice %315 {offsets = [0, 256], sizes = [2, 128], strides = [1, 1]} : vector<2x384xf32> to vector<2x128xf32>
    %338 = arith.addf %337, %34 : vector<2x128xf32>
    %339 = arith.mulf %325, %338 : vector<2x128xf32>
    %340 = arith.addf %336, %339 : vector<2x128xf32>
    %341 = math.tanh %340 : vector<2x128xf32>
    %342 = vector.extract_strided_slice %335 {offsets = [0, 0], sizes = [2, 16], strides = [1, 1]} : vector<2x128xf32> to vector<2x16xf32>
    %343 = vector.extract_strided_slice %341 {offsets = [0, 0], sizes = [2, 16], strides = [1, 1]} : vector<2x128xf32> to vector<2x16xf32>
    %cst_100 = arith.constant 1.000000e+00 : f32
    %344 = vector.broadcast %cst_100 : f32 to vector<2x16xf32>
    %345 = arith.subf %344, %342 : vector<2x16xf32>
    %346 = arith.mulf %345, %343 : vector<2x16xf32>
    %347 = arith.mulf %342, %276 : vector<2x16xf32>
    %348 = arith.addf %346, %347 : vector<2x16xf32>
    %349 = vector.extract_strided_slice %56 {offsets = [8, 0], sizes = [2, 384], strides = [1, 1]} : vector<12x384xf32> to vector<2x384xf32>
    %350 = vector.extract_strided_slice %349 {offsets = [0, 0], sizes = [2, 128], strides = [1, 1]} : vector<2x384xf32> to vector<2x128xf32>
    %351 = vector.extract_strided_slice %312 {offsets = [0, 0], sizes = [2, 128], strides = [1, 1]} : vector<2x384xf32> to vector<2x128xf32>
    %352 = arith.addf %350, %351 : vector<2x128xf32>
    %cst_101 = arith.constant 5.000000e-01 : f32
    %353 = vector.broadcast %cst_101 : f32 to vector<2x128xf32>
    %354 = arith.mulf %353, %352 : vector<2x128xf32>
    %355 = math.tanh %354 : vector<2x128xf32>
    %cst_102 = arith.constant 1.000000e+00 : f32
    %356 = vector.broadcast %cst_102 : f32 to vector<2x128xf32>
    %357 = arith.addf %355, %356 : vector<2x128xf32>
    %cst_103 = arith.constant 5.000000e-01 : f32
    %358 = vector.broadcast %cst_103 : f32 to vector<2x128xf32>
    %359 = arith.mulf %358, %357 : vector<2x128xf32>
    %360 = vector.extract_strided_slice %349 {offsets = [0, 128], sizes = [2, 128], strides = [1, 1]} : vector<2x384xf32> to vector<2x128xf32>
    %361 = vector.extract_strided_slice %312 {offsets = [0, 128], sizes = [2, 128], strides = [1, 1]} : vector<2x384xf32> to vector<2x128xf32>
    %362 = arith.addf %360, %361 : vector<2x128xf32>
    %cst_104 = arith.constant 5.000000e-01 : f32
    %363 = vector.broadcast %cst_104 : f32 to vector<2x128xf32>
    %364 = arith.mulf %363, %362 : vector<2x128xf32>
    %365 = math.tanh %364 : vector<2x128xf32>
    %cst_105 = arith.constant 1.000000e+00 : f32
    %366 = vector.broadcast %cst_105 : f32 to vector<2x128xf32>
    %367 = arith.addf %365, %366 : vector<2x128xf32>
    %cst_106 = arith.constant 5.000000e-01 : f32
    %368 = vector.broadcast %cst_106 : f32 to vector<2x128xf32>
    %369 = arith.mulf %368, %367 : vector<2x128xf32>
    %370 = vector.extract_strided_slice %349 {offsets = [0, 256], sizes = [2, 128], strides = [1, 1]} : vector<2x384xf32> to vector<2x128xf32>
    %371 = vector.extract_strided_slice %312 {offsets = [0, 256], sizes = [2, 128], strides = [1, 1]} : vector<2x384xf32> to vector<2x128xf32>
    %372 = arith.addf %371, %31 : vector<2x128xf32>
    %373 = arith.mulf %359, %372 : vector<2x128xf32>
    %374 = arith.addf %370, %373 : vector<2x128xf32>
    %375 = math.tanh %374 : vector<2x128xf32>
    %376 = vector.extract_strided_slice %369 {offsets = [0, 0], sizes = [2, 16], strides = [1, 1]} : vector<2x128xf32> to vector<2x16xf32>
    %377 = vector.extract_strided_slice %375 {offsets = [0, 0], sizes = [2, 16], strides = [1, 1]} : vector<2x128xf32> to vector<2x16xf32>
    %cst_107 = arith.constant 1.000000e+00 : f32
    %378 = vector.broadcast %cst_107 : f32 to vector<2x16xf32>
    %379 = arith.subf %378, %376 : vector<2x16xf32>
    %380 = arith.mulf %379, %377 : vector<2x16xf32>
    %381 = arith.mulf %376, %310 : vector<2x16xf32>
    %382 = arith.addf %380, %381 : vector<2x16xf32>
    %cst_108 = arith.constant dense<0.000000e+00> : vector<2x768xf32>
    %383 = tpu.matmul %382, %22, %cst_108 {dimension_numbers = #tpu.dot_dimension_numbers<[1], [0], [0], [1], [0, 0, 1, 1], [], []>} : vector<2x16xf32>, vector<16x768xf32>, vector<2x768xf32> -> vector<2x768xf32>
    %384 = vector.extract_strided_slice %383 {offsets = [0, 0], sizes = [2, 384], strides = [1, 1]} : vector<2x768xf32> to vector<2x384xf32>
    %385 = vector.extract_strided_slice %383 {offsets = [0, 384], sizes = [2, 384], strides = [1, 1]} : vector<2x768xf32> to vector<2x384xf32>
    %386 = arith.addf %385, %28 : vector<2x384xf32>
    %cst_109 = arith.constant dense<0.000000e+00> : vector<2x384xf32>
    %387 = tpu.matmul %348, %23, %cst_109 {dimension_numbers = #tpu.dot_dimension_numbers<[1], [0], [0], [1], [0, 0, 1, 1], [], []>} : vector<2x16xf32>, vector<16x384xf32>, vector<2x384xf32> -> vector<2x384xf32>
    %388 = vector.extract_strided_slice %386 {offsets = [0, 0], sizes = [2, 128], strides = [1, 1]} : vector<2x384xf32> to vector<2x128xf32>
    %389 = vector.extract_strided_slice %387 {offsets = [0, 0], sizes = [2, 128], strides = [1, 1]} : vector<2x384xf32> to vector<2x128xf32>
    %390 = arith.addf %388, %389 : vector<2x128xf32>
    %cst_110 = arith.constant 5.000000e-01 : f32
    %391 = vector.broadcast %cst_110 : f32 to vector<2x128xf32>
    %392 = arith.mulf %391, %390 : vector<2x128xf32>
    %393 = math.tanh %392 : vector<2x128xf32>
    %cst_111 = arith.constant 1.000000e+00 : f32
    %394 = vector.broadcast %cst_111 : f32 to vector<2x128xf32>
    %395 = arith.addf %393, %394 : vector<2x128xf32>
    %cst_112 = arith.constant 5.000000e-01 : f32
    %396 = vector.broadcast %cst_112 : f32 to vector<2x128xf32>
    %397 = arith.mulf %396, %395 : vector<2x128xf32>
    %398 = vector.extract_strided_slice %386 {offsets = [0, 128], sizes = [2, 128], strides = [1, 1]} : vector<2x384xf32> to vector<2x128xf32>
    %399 = vector.extract_strided_slice %387 {offsets = [0, 128], sizes = [2, 128], strides = [1, 1]} : vector<2x384xf32> to vector<2x128xf32>
    %400 = arith.addf %398, %399 : vector<2x128xf32>
    %cst_113 = arith.constant 5.000000e-01 : f32
    %401 = vector.broadcast %cst_113 : f32 to vector<2x128xf32>
    %402 = arith.mulf %401, %400 : vector<2x128xf32>
    %403 = math.tanh %402 : vector<2x128xf32>
    %cst_114 = arith.constant 1.000000e+00 : f32
    %404 = vector.broadcast %cst_114 : f32 to vector<2x128xf32>
    %405 = arith.addf %403, %404 : vector<2x128xf32>
    %cst_115 = arith.constant 5.000000e-01 : f32
    %406 = vector.broadcast %cst_115 : f32 to vector<2x128xf32>
    %407 = arith.mulf %406, %405 : vector<2x128xf32>
    %408 = vector.extract_strided_slice %386 {offsets = [0, 256], sizes = [2, 128], strides = [1, 1]} : vector<2x384xf32> to vector<2x128xf32>
    %409 = vector.extract_strided_slice %387 {offsets = [0, 256], sizes = [2, 128], strides = [1, 1]} : vector<2x384xf32> to vector<2x128xf32>
    %410 = arith.addf %409, %34 : vector<2x128xf32>
    %411 = arith.mulf %397, %410 : vector<2x128xf32>
    %412 = arith.addf %408, %411 : vector<2x128xf32>
    %413 = math.tanh %412 : vector<2x128xf32>
    %414 = vector.extract_strided_slice %407 {offsets = [0, 0], sizes = [2, 16], strides = [1, 1]} : vector<2x128xf32> to vector<2x16xf32>
    %415 = vector.extract_strided_slice %413 {offsets = [0, 0], sizes = [2, 16], strides = [1, 1]} : vector<2x128xf32> to vector<2x16xf32>
    %cst_116 = arith.constant 1.000000e+00 : f32
    %416 = vector.broadcast %cst_116 : f32 to vector<2x16xf32>
    %417 = arith.subf %416, %414 : vector<2x16xf32>
    %418 = arith.mulf %417, %415 : vector<2x16xf32>
    %419 = arith.mulf %414, %348 : vector<2x16xf32>
    %420 = arith.addf %418, %419 : vector<2x16xf32>
    %421 = vector.extract_strided_slice %56 {offsets = [10, 0], sizes = [2, 384], strides = [1, 1]} : vector<12x384xf32> to vector<2x384xf32>
    %422 = vector.extract_strided_slice %421 {offsets = [0, 0], sizes = [2, 128], strides = [1, 1]} : vector<2x384xf32> to vector<2x128xf32>
    %423 = vector.extract_strided_slice %384 {offsets = [0, 0], sizes = [2, 128], strides = [1, 1]} : vector<2x384xf32> to vector<2x128xf32>
    %424 = arith.addf %422, %423 : vector<2x128xf32>
    %cst_117 = arith.constant 5.000000e-01 : f32
    %425 = vector.broadcast %cst_117 : f32 to vector<2x128xf32>
    %426 = arith.mulf %425, %424 : vector<2x128xf32>
    %427 = math.tanh %426 : vector<2x128xf32>
    %cst_118 = arith.constant 1.000000e+00 : f32
    %428 = vector.broadcast %cst_118 : f32 to vector<2x128xf32>
    %429 = arith.addf %427, %428 : vector<2x128xf32>
    %cst_119 = arith.constant 5.000000e-01 : f32
    %430 = vector.broadcast %cst_119 : f32 to vector<2x128xf32>
    %431 = arith.mulf %430, %429 : vector<2x128xf32>
    %432 = vector.extract_strided_slice %421 {offsets = [0, 128], sizes = [2, 128], strides = [1, 1]} : vector<2x384xf32> to vector<2x128xf32>
    %433 = vector.extract_strided_slice %384 {offsets = [0, 128], sizes = [2, 128], strides = [1, 1]} : vector<2x384xf32> to vector<2x128xf32>
    %434 = arith.addf %432, %433 : vector<2x128xf32>
    %cst_120 = arith.constant 5.000000e-01 : f32
    %435 = vector.broadcast %cst_120 : f32 to vector<2x128xf32>
    %436 = arith.mulf %435, %434 : vector<2x128xf32>
    %437 = math.tanh %436 : vector<2x128xf32>
    %cst_121 = arith.constant 1.000000e+00 : f32
    %438 = vector.broadcast %cst_121 : f32 to vector<2x128xf32>
    %439 = arith.addf %437, %438 : vector<2x128xf32>
    %cst_122 = arith.constant 5.000000e-01 : f32
    %440 = vector.broadcast %cst_122 : f32 to vector<2x128xf32>
    %441 = arith.mulf %440, %439 : vector<2x128xf32>
    %442 = vector.extract_strided_slice %421 {offsets = [0, 256], sizes = [2, 128], strides = [1, 1]} : vector<2x384xf32> to vector<2x128xf32>
    %443 = vector.extract_strided_slice %384 {offsets = [0, 256], sizes = [2, 128], strides = [1, 1]} : vector<2x384xf32> to vector<2x128xf32>
    %444 = arith.addf %443, %31 : vector<2x128xf32>
    %445 = arith.mulf %431, %444 : vector<2x128xf32>
    %446 = arith.addf %442, %445 : vector<2x128xf32>
    %447 = math.tanh %446 : vector<2x128xf32>
    %448 = vector.extract_strided_slice %441 {offsets = [0, 0], sizes = [2, 16], strides = [1, 1]} : vector<2x128xf32> to vector<2x16xf32>
    %449 = vector.extract_strided_slice %447 {offsets = [0, 0], sizes = [2, 16], strides = [1, 1]} : vector<2x128xf32> to vector<2x16xf32>
    %cst_123 = arith.constant 1.000000e+00 : f32
    %450 = vector.broadcast %cst_123 : f32 to vector<2x16xf32>
    %451 = arith.subf %450, %448 : vector<2x16xf32>
    %452 = arith.mulf %451, %449 : vector<2x16xf32>
    %453 = arith.mulf %448, %382 : vector<2x16xf32>
    %454 = arith.addf %452, %453 : vector<2x16xf32>
    %cst_124 = arith.constant dense<0.000000e+00> : vector<2x384xf32>
    %455 = tpu.matmul %454, %21, %cst_124 {dimension_numbers = #tpu.dot_dimension_numbers<[1], [0], [0], [1], [0, 0, 1, 1], [], []>} : vector<2x16xf32>, vector<16x384xf32>, vector<2x384xf32> -> vector<2x384xf32>
    %456 = arith.addf %455, %28 : vector<2x384xf32>
    %cst_125 = arith.constant dense<0.000000e+00> : vector<2x384xf32>
    %457 = tpu.matmul %420, %23, %cst_125 {dimension_numbers = #tpu.dot_dimension_numbers<[1], [0], [0], [1], [0, 0, 1, 1], [], []>} : vector<2x16xf32>, vector<16x384xf32>, vector<2x384xf32> -> vector<2x384xf32>
    %458 = vector.extract_strided_slice %456 {offsets = [0, 0], sizes = [2, 128], strides = [1, 1]} : vector<2x384xf32> to vector<2x128xf32>
    %459 = vector.extract_strided_slice %457 {offsets = [0, 0], sizes = [2, 128], strides = [1, 1]} : vector<2x384xf32> to vector<2x128xf32>
    %460 = arith.addf %458, %459 : vector<2x128xf32>
    %cst_126 = arith.constant 5.000000e-01 : f32
    %461 = vector.broadcast %cst_126 : f32 to vector<2x128xf32>
    %462 = arith.mulf %461, %460 : vector<2x128xf32>
    %463 = math.tanh %462 : vector<2x128xf32>
    %cst_127 = arith.constant 1.000000e+00 : f32
    %464 = vector.broadcast %cst_127 : f32 to vector<2x128xf32>
    %465 = arith.addf %463, %464 : vector<2x128xf32>
    %cst_128 = arith.constant 5.000000e-01 : f32
    %466 = vector.broadcast %cst_128 : f32 to vector<2x128xf32>
    %467 = arith.mulf %466, %465 : vector<2x128xf32>
    %468 = vector.extract_strided_slice %456 {offsets = [0, 128], sizes = [2, 128], strides = [1, 1]} : vector<2x384xf32> to vector<2x128xf32>
    %469 = vector.extract_strided_slice %457 {offsets = [0, 128], sizes = [2, 128], strides = [1, 1]} : vector<2x384xf32> to vector<2x128xf32>
    %470 = arith.addf %468, %469 : vector<2x128xf32>
    %cst_129 = arith.constant 5.000000e-01 : f32
    %471 = vector.broadcast %cst_129 : f32 to vector<2x128xf32>
    %472 = arith.mulf %471, %470 : vector<2x128xf32>
    %473 = math.tanh %472 : vector<2x128xf32>
    %cst_130 = arith.constant 1.000000e+00 : f32
    %474 = vector.broadcast %cst_130 : f32 to vector<2x128xf32>
    %475 = arith.addf %473, %474 : vector<2x128xf32>
    %cst_131 = arith.constant 5.000000e-01 : f32
    %476 = vector.broadcast %cst_131 : f32 to vector<2x128xf32>
    %477 = arith.mulf %476, %475 : vector<2x128xf32>
    %478 = vector.extract_strided_slice %456 {offsets = [0, 256], sizes = [2, 128], strides = [1, 1]} : vector<2x384xf32> to vector<2x128xf32>
    %479 = vector.extract_strided_slice %457 {offsets = [0, 256], sizes = [2, 128], strides = [1, 1]} : vector<2x384xf32> to vector<2x128xf32>
    %480 = arith.addf %479, %34 : vector<2x128xf32>
    %481 = arith.mulf %467, %480 : vector<2x128xf32>
    %482 = arith.addf %478, %481 : vector<2x128xf32>
    %483 = math.tanh %482 : vector<2x128xf32>
    %484 = vector.extract_strided_slice %477 {offsets = [0, 0], sizes = [2, 16], strides = [1, 1]} : vector<2x128xf32> to vector<2x16xf32>
    %485 = vector.extract_strided_slice %483 {offsets = [0, 0], sizes = [2, 16], strides = [1, 1]} : vector<2x128xf32> to vector<2x16xf32>
    %cst_132 = arith.constant 1.000000e+00 : f32
    %486 = vector.broadcast %cst_132 : f32 to vector<2x16xf32>
    %487 = arith.subf %486, %484 : vector<2x16xf32>
    %488 = arith.mulf %487, %485 : vector<2x16xf32>
    %489 = arith.mulf %484, %420 : vector<2x16xf32>
    %490 = arith.addf %488, %489 : vector<2x16xf32>
    %cst_133 = arith.constant dense<0.000000e+00> : vector<2x32xf32>
    %491 = tpu.matmul %490, %37, %cst_133 {dimension_numbers = #tpu.dot_dimension_numbers<[1], [0], [0], [1], [0, 0, 1, 1], [], []>} : vector<2x16xf32>, vector<16x32xf32>, vector<2x32xf32> -> vector<2x32xf32>
    %c0_134 = arith.constant 0 : index
    %c12 = arith.constant 12 : index
    %492 = vector.load %arg1[%c0_134, %c12] : memref<12x16xf32, #tpu.memory_space<vmem>>, vector<2x4xf32>
    %cst_135 = arith.constant dense<0.000000e+00> : vector<2x32xf32>
    %493 = tpu.matmul %492, %38, %cst_135 {dimension_numbers = #tpu.dot_dimension_numbers<[1], [0], [0], [1], [0, 0, 1, 1], [], []>} : vector<2x4xf32>, vector<4x32xf32>, vector<2x32xf32> -> vector<2x32xf32>
    %494 = arith.addf %491, %493 : vector<2x32xf32>
    %c0_136 = arith.constant 0 : index
    %c0_137 = arith.constant 0 : index
    %495 = vector.load %arg5[%c0_136, %c0_137] : memref<2x32xf32, #tpu.memory_space<vmem>>, vector<2x32xf32>
    %496 = arith.addf %494, %495 : vector<2x32xf32>
    %497 = vector.broadcast %39 : vector<1x32xf32> to vector<2x32xf32>
    %498 = arith.addf %496, %497 : vector<2x32xf32>
    %cst_138 = arith.constant 5.000000e-01 : f32
    %499 = vector.broadcast %cst_138 : f32 to vector<2x32xf32>
    %500 = arith.mulf %499, %498 : vector<2x32xf32>
    %501 = math.tanh %500 : vector<2x32xf32>
    %cst_139 = arith.constant 1.000000e+00 : f32
    %502 = vector.broadcast %cst_139 : f32 to vector<2x32xf32>
    %503 = arith.addf %501, %502 : vector<2x32xf32>
    %cst_140 = arith.constant 5.000000e-01 : f32
    %504 = vector.broadcast %cst_140 : f32 to vector<2x32xf32>
    %505 = arith.mulf %504, %503 : vector<2x32xf32>
    %506 = arith.mulf %498, %505 : vector<2x32xf32>
    %cst_141 = arith.constant dense<0.000000e+00> : vector<2x128xf32>
    %507 = tpu.matmul %506, %40, %cst_141 {dimension_numbers = #tpu.dot_dimension_numbers<[1], [0], [0], [1], [0, 0, 1, 1], [], []>} : vector<2x32xf32>, vector<32x128xf32>, vector<2x128xf32> -> vector<2x128xf32>
    %508 = vector.broadcast %41 : vector<1x128xf32> to vector<2x128xf32>
    %509 = arith.addf %507, %508 : vector<2x128xf32>
    %c0_142 = arith.constant 0 : index
    %c0_143 = arith.constant 0 : index
    %510 = vector.load %arg4[%c0_142, %c0_143] : memref<2x128xf32, #tpu.memory_space<vmem>>, vector<2x128xf32>
    tpu.vector_store %arg4[%c0_142, %c0_143], %509 {strides = array<i32>} : memref<2x128xf32, #tpu.memory_space<vmem>>, vector<2x128xf32>,
    return
  }
}

</mosaic_0001>

<bundles_post_ra>
// kernel: _model_forward.1
= control target key start
LH: loop header
LB: loop body
LE: loop exit
PB: predicated region body
PF: predicated region fallthrough
CT: control target
= control target key end

     0   :  { %9 = vsyncpa [#allocation4], 0  ;;  %s3971_s0 = inlined_call_operand.vmem [shape: s32[4], index: 0, kind: input, shape index: {}]   ;;  %s3972_s1 = inlined_call_operand.vmem [shape: f32[12,16], index: 1, kind: input, shape index: {}]   ;;  %s3973_s2 = inlined_call_operand.vmem [shape: f32[112,128], index: 2, kind: input, shape index: {}]   ;;  %s3974_s3 = inlined_call_operand.vmem [shape: f32[64,384], index: 3, kind: input, shape index: {}]   ;;  %s3975_s4 = inlined_call_operand.vmem [shape: f32[2,128], index: 4, kind: output, shape index: {}]  }
   0x1   :  { %s16_s17 = sshll.u32 %s3971_s0, 4  ;;  %s17_s17 = int_to_ptr.vmem [resolvable:$true] %s16_s17 }
   0x2   :  { %s3404_s18 = scalar_lea.vmem %s17_s17, 16  ;;  %p3409_p1 = scmp.lt.s32.totalorder %s17_s17, %s17_s17 }
   0x3   :  { %p3405_p0 = scmp.ne.s32.totalorder %s17_s17, %s3404_s18  ;;  %p3410_p2 = scmp.lt.s32.totalorder %s3404_s18, %s3404_s18 }
   0x5   :  { %p3411_p3 = por %p3410_p2, %p3409_p1 }
   0x7   :  { %p3412_p4 = pnand %p3411_p3, %p3405_p0 }
   0x9   :  { %3415 = shalt.err (!%p3412_p4)
}
   0xa   :  { %s3418_s19 = smov [#allocation3]  }
   0xb   :  { %19 = dma.vmem_to_smem %s17_s17, 16, %s3418_s19, [#allocation4]  }
   0xc   :  { %3416 = dma.done.wait [#allocation4], 16  }
   0xd   :  { %3417 = vsyncadd [#allocation4], 4294967280 }
   0xe   :  { %29 = sfence }
   0xf   :  { %v95_v0 = vld [vmem:[%s3973_s2 + $0x8] sm:$0xf]  ;;  %vm119_vm0 = vcmask 1043456   ;;  %v94_v1 = vld [vmem:[%s3973_s2] sm:$0xff]  ;;  %vm112_vm1 = vcmask 97280   ;;  %v70_v4 = vld [vmem:[%s3974_s3 + $0x98] sm:$0xff]  ;;  %v77_v35 = vlaneseq }
  0x10   :  { %v106_v2 = vld [vmem:[%s3972_s1] sm:$0xff]  ;;  %3238 = vmatprep.subr.msk.mxu0 %vm119_vm0, %v95_v0  ;;  %v107_v3 = vld [vmem:[%s3972_s1 + $0x8] sm:$0xf]  ;;  %261 = vmatprep.subr.mxu1 %v70_v4  ;;  %v69_v5 = vld [vmem:[%s3974_s3 + $0x90] sm:$0xff]  ;;  %v3419_v7 = vmov 0.0   ;;  %vm224_vm2 = vcmask 64512  }
  0x11   :  { %3242 = vmatprep.mubr.msk.f32.mxu0 %vm112_vm1, %v106_v2  ;;  %3239 = vmatpush3.msk.msra.mxu0 %vm119_vm0, %v95_v0  ;;  %v71_v6 = vld [vmem:[%s3974_s3 + $0xa0] sm:$0xff]  ;;  %v3478_v8 = vld [vmem:[%s3974_s3 + $0x48] sm:$0xff]  ;;  %v3488_v10 = vld [vmem:[%s3974_s3 + $0x30] sm:$0xff]  ;;  %v3552_v36 = vshrl.u32 %v77_v35, 7  ;;  %vm383_vm3 = vcmask 130048   ;;  %vm3420_vm4 = vmmov 0  }
  0x12   :  { %3240 = vmatprep.subr.mxu0 %v94_v1  ;;  %262 = vmatpush1.msra.mxu1 %v69_v5  ;;  %v3483_v9 = vld [vmem:[%s3974_s3 + $0x28] sm:$0xff]  ;;  %v3494_v11 = vld [vmem:[%s3974_s3 + $0x10] sm:$0xff]  ;;  %v3511_v26 = vld [vmem:[%s3974_s3 + $0x20] sm:$0xff]  ;;  %s3421_s26 = smov 116   ;;  %vm2897_vm5 = vcmask 31744   ;;  %s30_s6 = sld [smem:[#allocation3]] }
  0x13   :  { %3241 = vmatpush3.msra.mxu0 %v94_v1  ;;  %295 = vmatprep.mubr.f32.mxu1 %v3419_v7  ;;  %v3159_v12 = vld [vmem:[%s3973_s2 + $0x68] ss:$0 sm:$0xff]  ;;  %v3518_v28 = vld [vmem:[%s3974_s3 + $0x18] sm:$0xff]  ;;  %v3528_v30 = vld [vmem:[%s3974_s3] sm:$0xff]  ;;  %v79_v37 = vsub.s32 0, %v3552_v36  ;;  %v83_v40 = vsub.s32 1, %v3552_v36 }
  0x14   :  { %3243 = vmatmul.mubr.msk.f32.vlgmr.msra.gmra.mxu0 %vm112_vm1, %v107_v3  ;;  %3245 = vmatprep.subr.mxu1 %v71_v6  ;;  %v3523_v29 = vld [vmem:[%s3974_s3 + $0x8] sm:$0xff]  ;;  %v3543_v33 = vld [vmem:[%s3974_s3 + $0x58] sm:$0xff]  ;;  %v3548_v34 = vld [vmem:[%s3974_s3 + $0x80] sm:$0xff]  ;;  %v87_v41 = vsub.s32 2, %v3552_v36  ;;  %s3150_s7 = sld [smem:[#allocation3 + $0x2]]  ;;  %vm39_vm6 = vcmask 253952  }
  0x15   :  { %522 = vmatprep.mubr.f32.mxu0 %v3419_v7  ;;  %486 = vmatprep.subr.mxu0 %v3478_v8  ;;  %v3157_v38 = vld [vmem:[%s3974_s3 + $0xa8] ss:$8 sm:$0x7]  ;;  %v3581_v61 = vld [vmem:[%s3974_s3 + $0xaa] ss:$0 sm:$0xff]  ;;  %s3153_s8 = sld [smem:[#allocation3 + $0x1]] }
  0x16   :  { %487 = vmatpush1.msra.mxu0 %v3483_v9  ;;  %v212_v43 = vrot.slane %v3157_v38, %v79_v37  ;;  %v216_v45 = vrot.slane %v3157_v38, %v83_v40  ;;  %v220_v47 = vrot.slane %v3157_v38, %v87_v41  ;;  %s3154_s9 = sld [smem:[#allocation3 + $0x3]]  ;;  %vm3062_vm7 = vcmask 261120  }
  0x17   :  { %488 = vmatprep.subr.mxu0 %v3488_v10 }
  0x18   :  { %489 = vmatpush1.msra.mxu0 %v3494_v11  ;;  %s3142_s12 = scalar_lea.vmem %s3973_s2, %s30_s6 }
  0x19   :  { %523 = vmatmul.mubr.f32.vlgmr.msra.gmra.mxu0 %v3419_v7  ;;  %648 = vmatprep.subr.mxu0 %v3478_v8 }
  0x1a   :  { %649 = vmatpush1.msra.mxu0 %v3483_v9  ;;  %684 = vmatprep.mubr.f32.mxu0 %v3419_v7  ;;  %s3144_s15 = scalar_lea.vmem %s3973_s2, %s3150_s7 }
  0x1b   :  { %650 = vmatprep.subr.mxu0 %v3488_v10  ;;  %s3146_s18 = scalar_lea.vmem %s3973_s2, %s3153_s8 }
  0x1c   :  { %651 = vmatpush1.msra.mxu0 %v3494_v11  ;;  %s3148_s21 = scalar_lea.vmem %s3973_s2, %s3154_s9 }
  0x1d   :  { %793 = vmatprep.subr.mxu0 %v3548_v34 }
  0xd4   :  { %v3244_v13 = vpop.f32.mrf.mxu0 }
  0xd5   :  { %v195_v14 = vadd.f32 %v3244_v13, %v3159_v12 }
  0xd6   :  { %v189_v15 = vpop.f32.mrf.mxu0 }
  0xd7   :  { %v199_v16 = vmul.f32 0.5, %v195_v14  ;;  %v190_v17 = vadd.f32 %v3159_v12, %v189_v15 }
  0xd9   :  { %3326 = vtanh.f32 %v199_v16  ;;  %v198_v18 = vmul.f32 0.5, %v190_v17  ;;  %v524_v31 = vpop.f32.mrf.mxu0 }
  0xda   :  { %v538_v0 = vadd.f32 %v524_v31, %v3581_v61 }
  0xdb   :  { %3328 = vtanh.f32 %v198_v18  ;;  %v526_v32 = vpop.f32.mrf.mxu0  ;;  %v3592_v18 = vld [vmem:[%s3974_s3 + $0x50] sm:$0xff] }
  0xe6   :  { %v3327_v19 = vpop.eup %3326 }
  0xe7   :  { %v203_v21 = vadd.f32 1.0, %v3327_v19  ;;  %v3597_v19 = vld [vmem:[%s3974_s3 + $0x78] sm:$0xff] }
  0xe8   :  { %v3329_v20 = vpop.eup %3328 }
  0xe9   :  { %v202_v22 = vadd.f32 1.0, %v3329_v20  ;;  %v205_v24 = vmul.f32 0.5, %v203_v21  ;;  %v3602_v20 = vld [vmem:[%s3974_s3 + $0x40] sm:$0xff]  ;;  %v3607_v21 = vld [vmem:[%s3974_s3 + $0x68] sm:$0xff] }
  0xeb   :  { %v204_v23 = vmul.f32 0.5, %v202_v22  ;;  %v207_v27 = vmul.f32 %v205_v24, %v195_v14  ;;  %v3616_v22 = vld [vmem:[%s3974_s3 + $0x38] sm:$0xff]  ;;  %v3634_v24 = vld [vmem:[%s3974_s3 + $0x88] sm:$0xff] }
  0xed   :  { %v206_v25 = vmul.f32 %v204_v23, %v190_v17  ;;  %v3623_v23 = vld [vmem:[%s3974_s3 + $0x60] sm:$0xff] }
  0xef   :  { %3163 = vmatmul.mubr.msk.f32.vlgmr.msra.gmra.mxu1 %vm224_vm2, %v206_v25 }
  0xf0   :  { %3246 = vmatpush3.msra.mxu1 %v71_v6  ;;  %301 = vmatprep.mubr.f32.mxu1 %v3419_v7 }
  0xf1   :  { %415 = vmatprep.subr.mxu1 %v3511_v26 }
  0xf3   :  { %3164 = vmatmul.mubr.msk.f32.gmra.mxu1 %vm224_vm2, %v207_v27 }
  0xf4   :  { %3247 = vmatprep.mubr.msk.f32.mxu1 %vm224_vm2, %v206_v25  ;;  %v3643_v25 = vld [vmem:[%s3974_s3 + $0x70] sm:$0xff] }
  0xf7   :  { %3248 = vmatmul.mubr.msk.f32.vlgmr.msra.gmra.mxu1 %vm224_vm2, %v207_v27  ;;  %v3158_v27 = vld [vmem:[%s3974_s3 + $0xa9] ss:$8 sm:$0x7] }
  0xf8   :  { %416 = vmatpush1.msra.mxu1 %v3518_v28  ;;  %451 = vmatprep.mubr.f32.mxu1 %v3419_v7  ;;  %v3668_v31 = vrot.slane %v3158_v27, %v79_v37 }
  0xf9   :  { %417 = vmatprep.subr.mxu1 %v3523_v29 }
  0xfa   :  { %418 = vmatpush1.msra.mxu1 %v3528_v30 }
  0xfb   :  { %452 = vmatmul.mubr.f32.vlgmr.msra.gmra.mxu1 %v3419_v7  ;;  %577 = vmatprep.subr.mxu1 %v3511_v26 }
  0xfc   :  { %578 = vmatpush1.msra.mxu1 %v3518_v28  ;;  %613 = vmatprep.mubr.f32.mxu1 %v3419_v7 }
  0xfd   :  { %579 = vmatprep.subr.mxu1 %v3523_v29 }
  0xfe   :  { %580 = vmatpush1.msra.mxu1 %v3528_v30 }
  0xff   :  { %719 = vmatprep.subr.mxu1 %v3543_v33 }
 0x1af   :  { %v297_v39 = vpop.f32.mrf.mxu1 }
 0x1b0   :  { %v3572_v53 = vadd.f32 %v297_v39, %v212_v43 }
 0x1b1   :  { %v299_v42 = vpop.f32.mrf.mxu1 }
 0x1b2   :  { %v3575_v58 = vadd.f32 %v299_v42, %v216_v45 }
 0x1b3   :  { %v303_v44 = vpop.f32.mrf.mxu1 }
 0x1b4   :  { %v3564_v46 = vadd.f32 %v303_v44, %v212_v43 }
 0x1b5   :  { %v305_v48 = vpop.f32.mrf.mxu1 }
 0x1b6   :  { %v3568_v49 = vadd.f32 %v305_v48, %v216_v45 }
 0x1b7   :  { %v3249_v50 = vpop.f32.mrf.mxu1 }
 0x1b8   :  { %v3570_v51 = vadd.f32 %v3249_v50, %v220_v47 }
 0x1b9   :  { %v374_v52 = vpop.f32.mrf.mxu1 }
 0x1ba   :  { %v3584_v2 = vadd.f32 %v374_v52, %v220_v47  ;;  %v3674_v52 = vrot.slane %v3158_v27, %v83_v40 }
 0x1bb   :  { %v453_v54 = vpop.f32.mrf.mxu1 }
 0x1bc   :  { %v528_v55 = vadd.f32 %v453_v54, %v3572_v53 }
 0x1bd   :  { %v455_v57 = vpop.f32.mrf.mxu1 }
 0x1be   :  { %v529_v56 = vmul.f32 0.5, %v528_v55  ;;  %v533_v59 = vadd.f32 %v455_v57, %v3575_v58 }
 0x1c0   :  { %3330 = vtanh.f32 %v529_v56  ;;  %v534_v60 = vmul.f32 0.5, %v533_v59 }
 0x1c2   :  { %3332 = vtanh.f32 %v534_v60 }
 0x1cd   :  { %v3331_v62 = vpop.eup %3330 }
 0x1ce   :  { %v531_v63 = vadd.f32 1.0, %v3331_v62 }
 0x1cf   :  { %v3333_v5 = vpop.eup %3332 }
 0x1d0   :  { %v532_v1 = vmul.f32 0.5, %v531_v63  ;;  %v536_v6 = vadd.f32 1.0, %v3333_v5  ;;  %v3682_v5 = vld [vmem:[%s3974_s3 + $0xab] ss:$0 sm:$0xff] }
 0x1d2   :  { %v539_v3 = vmul.f32 %v538_v0, %v532_v1  ;;  %v537_v12 = vmul.f32 0.5, %v536_v6 }
 0x1d4   :  { %v540_v4 = vadd.f32 %v539_v3, %v3584_v2  ;;  %v542_v13 = vsub.f32 1.0, %v537_v12  ;;  %v544_v15 = vmul.f32 0.0, %v537_v12 }
 0x1d6   :  { %3334 = vtanh.f32 %v540_v4 }
 0x1e3   :  { %v3335_v14 = vpop.eup %3334 }
 0x1e4   :  { %v543_v16 = vmul.f32 %v3335_v14, %v542_v13  ;;  %v3686_v14 = vrot.slane %v3158_v27, %v87_v41 }
 0x1e6   :  { %v3587_v17 = vadd.f32 %v544_v15, %v543_v16 }
 0x1e8   :  { %3167 = vmatmul.mubr.msk.f32.vlgmr.msra.gmra.mxu1 %vm383_vm3, %v3587_v17  ;;  %3168 = vmatmul.mubr.msk.f32.vlgmr.msra.gmra.mxu0 %vm383_vm3, %v3587_v17  ;;  %v949_v27 = vrot.slane %v3587_v17, 6 }
 0x1e9   :  { %720 = vmatpush1.msra.mxu1 %v3592_v18  ;;  %794 = vmatpush1.msra.mxu0 %v3597_v19 }
 0x1ea   :  { %721 = vmatprep.subr.mxu1 %v3602_v20  ;;  %795 = vmatprep.subr.mxu0 %v3607_v21 }
 0x1eb   :  { %722 = vmatpush1.msra.mxu1 %v3616_v22  ;;  %755 = vmatprep.mubr.f32.mxu1 %v3419_v7 }
 0x1ec   :  { %796 = vmatpush1.msra.mxu0 %v3623_v23  ;;  %829 = vmatprep.mubr.f32.mxu0 %v3419_v7 }
 0x1ed   :  { %3169 = vmatmul.mubr.msk.f32.vlgmr.msra.gmra.mxu1 %vm383_vm3, %v3587_v17  ;;  %830 = vmatmul.mubr.f32.vlgmr.msra.gmra.mxu0 %v3419_v7 }
 0x1ee   :  { %3250 = vmatprep.subr.mxu1 %v3419_v7  ;;  %3254 = vmatprep.mubr.msk.f32.mxu1 %vm3420_vm4, %v3419_v7 }
 0x1ef   :  { %3251 = vmatpush3.msra.mxu1 %v3634_v24  ;;  %985 = vmatprep.subr.mxu0 %v3511_v26 }
 0x1f0   :  { %3252 = vmatprep.subr.mxu1 %v3419_v7  ;;  %986 = vmatpush1.msra.mxu0 %v3518_v28 }
 0x1f1   :  { %3253 = vmatpush3.msra.mxu1 %v3643_v25  ;;  %987 = vmatprep.subr.mxu0 %v3523_v29 }
 0x1f2   :  { %3255 = vmatmul.mubr.f32.vlgmr.msra.gmra.mxu1 %v3419_v7  ;;  %1056 = vmatprep.subr.mxu1 %v3478_v8 }
 0x1f3   :  { %1057 = vmatpush1.msra.mxu1 %v3483_v9  ;;  %988 = vmatpush1.msra.mxu0 %v3528_v30 }
 0x1f4   :  { %1058 = vmatprep.subr.mxu1 %v3488_v10  ;;  %1021 = vmatprep.mubr.f32.mxu0 %v3419_v7 }
 0x1f5   :  { %1059 = vmatpush1.msra.mxu1 %v3494_v11  ;;  %1092 = vmatprep.mubr.f32.mxu1 %v3419_v7 }
 0x1f6   :  { %1127 = vmatprep.subr.mxu0 %v3543_v33  ;;  %1204 = vmatprep.subr.mxu1 %v3548_v34 }
 0x2a8   :  { %v615_v32 = vpop.f32.mrf.mxu1  ;;  %v686_v35 = vpop.f32.mrf.mxu0 }
 0x2a9   :  { %v925_v38 = vrot.slane %v615_v32, 6  ;;  %v940_v3 = vadd.f32 %v686_v35, %v3581_v61 }
 0x2aa   :  { %v617_v39 = vpop.f32.mrf.mxu1  ;;  %v688_v42 = vpop.f32.mrf.mxu0 }
 0x2ab   :  { %v927_v43 = vadd.f32 %v925_v38, %v3572_v53  ;;  %v762_v44 = vadd.f32 %v688_v42, %v3668_v31  ;;  %v933_v47 = vrot.slane %v617_v39, 6  ;;  %v942_v13 = vrot.slane %v940_v3, 6 }
 0x2ad   :  { %v928_v45 = vmul.f32 0.5, %v927_v43  ;;  %v757_v48 = vpop.f32.mrf.mxu1  ;;  %v831_v50 = vpop.f32.mrf.mxu0  ;;  %v935_v56 = vadd.f32 %v933_v47, %v3575_v58 }
 0x2ae   :  { %v906_v54 = vadd.f32 %v831_v50, %v762_v44  ;;  %v763_v57 = vadd.f32 %v757_v48, %v3674_v52 }
 0x2af   :  { %3336 = vtanh.f32 %v928_v45  ;;  %v759_v55 = vpop.f32.mrf.mxu1  ;;  %v833_v60 = vpop.f32.mrf.mxu0  ;;  %v936_v63 = vmul.f32 0.5, %v935_v56 }
 0x2b0   :  { %v907_v37 = vmul.f32 0.5, %v906_v54  ;;  %v911_v0 = vadd.f32 %v833_v60, %v763_v57  ;;  %v764_v39 = vadd.f32 %v759_v55, %v3686_v14 }
 0x2b2   :  { %3338 = vtanh.f32 %v907_v37  ;;  %v902_v59 = vpop.f32.mrf.mxu1  ;;  %v912_v1 = vmul.f32 0.5, %v911_v0 }
 0x2b3   :  { %3340 = vtanh.f32 %v936_v63  ;;  %v916_v16 = vadd.f32 %v902_v59, %v3682_v5 }
 0x2b4   :  { %v3256_v62 = vpop.f32.mrf.mxu1  ;;  %3342 = vtanh.f32 %v912_v1 }
 0x2bc   :  { %v3337_v40 = vpop.eup %3336 }
 0x2bd   :  { %v930_v4 = vadd.f32 1.0, %v3337_v40 }
 0x2bf   :  { %v3339_v6 = vpop.eup %3338  ;;  %v931_v12 = vmul.f32 0.5, %v930_v4 }
 0x2c0   :  { %v909_v15 = vadd.f32 1.0, %v3339_v6  ;;  %v3341_v43 = vpop.eup %3340 }
 0x2c1   :  { %v944_v32 = vmul.f32 %v942_v13, %v931_v12  ;;  %v938_v45 = vadd.f32 1.0, %v3341_v43  ;;  %v3343_v47 = vpop.eup %3342 }
 0x2c2   :  { %v910_v35 = vmul.f32 0.5, %v909_v15  ;;  %v914_v36 = vadd.f32 1.0, %v3343_v47 }
 0x2c3   :  { %v945_v38 = vadd.f32 %v944_v32, %v3584_v2  ;;  %v939_v48 = vmul.f32 0.5, %v938_v45 }
 0x2c4   :  { %v917_v42 = vmul.f32 %v916_v16, %v910_v35  ;;  %v915_v54 = vmul.f32 0.5, %v914_v36 }
 0x2c5   :  { %3344 = vtanh.f32 %v945_v38  ;;  %v947_v41 = vsub.f32 1.0, %v939_v48  ;;  %v951_v56 = vmul.f32 %v949_v27, %v939_v48 }
 0x2c6   :  { %v918_v44 = vadd.f32 %v917_v42, %v764_v39  ;;  %v920_v55 = vsub.f32 1.0, %v915_v54  ;;  %v922_v63 = vmul.f32 0.0, %v915_v54 }
 0x2c8   :  { %3346 = vtanh.f32 %v918_v44 }
 0x2d2   :  { %v3345_v50 = vpop.eup %3344 }
 0x2d3   :  { %v948_v37 = vmul.f32 %v3345_v50, %v947_v41 }
 0x2d5   :  { %v3347_v57 = vpop.eup %3346  ;;  %v3692_v59 = vadd.f32 %v951_v56, %v948_v37 }
 0x2d6   :  { %v921_v62 = vmul.f32 %v3347_v57, %v920_v55 }
 0x2d7   :  { %v954_v60 = vrot.slane %v3692_v59, 2 }
 0x2d8   :  { %v3703_v17 = vadd.f32 %v922_v63, %v921_v62 }
 0x2d9   :  { %3170 = vmatmul.mubr.msk.f32.vlgmr.msra.gmra.mxu0 %vm383_vm3, %v954_v60  ;;  %3171 = vmatmul.mubr.msk.f32.vlgmr.msra.gmra.mxu1 %vm383_vm3, %v954_v60 }
 0x2da   :  { %1128 = vmatpush1.msra.mxu0 %v3592_v18  ;;  %1205 = vmatpush1.msra.mxu1 %v3597_v19 }
 0x2db   :  { %1129 = vmatprep.subr.mxu0 %v3602_v20  ;;  %1206 = vmatprep.subr.mxu1 %v3607_v21 }
 0x2dc   :  { %1130 = vmatpush1.msra.mxu0 %v3616_v22  ;;  %1163 = vmatprep.mubr.f32.mxu0 %v3419_v7 }
 0x2dd   :  { %1207 = vmatpush1.msra.mxu1 %v3623_v23  ;;  %1240 = vmatprep.mubr.f32.mxu1 %v3419_v7 }
 0x2de   :  { %3172 = vmatmul.mubr.msk.f32.vlgmr.msra.gmra.mxu0 %vm383_vm3, %v954_v60  ;;  %3173 = vmatmul.mubr.msk.f32.vlgmr.msra.gmra.mxu1 %vm383_vm3, %v3703_v17 }
 0x2df   :  { %3257 = vmatprep.subr.mxu0 %v3419_v7  ;;  %3261 = vmatprep.mubr.msk.f32.mxu0 %vm3420_vm4, %v3419_v7 }
 0x2e0   :  { %3258 = vmatpush3.msra.mxu0 %v3634_v24  ;;  %1396 = vmatprep.subr.mxu1 %v3511_v26 }
 0x2e1   :  { %3259 = vmatprep.subr.mxu0 %v3419_v7  ;;  %1397 = vmatpush1.msra.mxu1 %v3518_v28 }
 0x2e2   :  { %3260 = vmatpush3.msra.mxu0 %v3643_v25  ;;  %1398 = vmatprep.subr.mxu1 %v3523_v29 }
 0x2e3   :  { %3262 = vmatmul.mubr.msk.f32.vlgmr.msra.gmra.mxu0 %vm383_vm3, %v3703_v17  ;;  %1467 = vmatprep.subr.mxu0 %v3478_v8 }
 0x2e4   :  { %1468 = vmatpush1.msra.mxu0 %v3483_v9  ;;  %1399 = vmatpush1.msra.mxu1 %v3528_v30 }
 0x2e5   :  { %1469 = vmatprep.subr.mxu0 %v3488_v10  ;;  %1432 = vmatprep.mubr.f32.mxu1 %v3419_v7 }
 0x2e6   :  { %1470 = vmatpush1.msra.mxu0 %v3494_v11  ;;  %1503 = vmatprep.mubr.f32.mxu0 %v3419_v7 }
 0x2e7   :  { %1538 = vmatprep.subr.mxu1 %v3543_v33  ;;  %1615 = vmatprep.subr.mxu0 %v3548_v34 }
 0x399   :  { %v1023_v0 = vpop.f32.mrf.mxu0  ;;  %v1094_v1 = vpop.f32.mrf.mxu1 }
 0x39a   :  { %v1336_v3 = vrot.slane %v1023_v0, 4  ;;  %v1351_v27 = vadd.f32 %v1094_v1, %v3581_v61 }
 0x39b   :  { %v1025_v40 = vpop.f32.mrf.mxu0  ;;  %v1096_v4 = vpop.f32.mrf.mxu1 }
 0x39c   :  { %v1338_v6 = vadd.f32 %v1336_v3, %v3572_v53  ;;  %v1170_v12 = vadd.f32 %v1096_v4, %v3668_v31  ;;  %v1344_v15 = vrot.slane %v1025_v40, 4  ;;  %v1353_v57 = vrot.slane %v1351_v27, 4 }
 0x39e   :  { %v1339_v13 = vmul.f32 0.5, %v1338_v6  ;;  %v1165_v16 = vpop.f32.mrf.mxu0  ;;  %v1242_v32 = vpop.f32.mrf.mxu1  ;;  %v1346_v42 = vadd.f32 %v1344_v15, %v3575_v58 }
 0x39f   :  { %v1317_v35 = vadd.f32 %v1242_v32, %v1170_v12  ;;  %v1171_v43 = vadd.f32 %v1165_v16, %v3674_v52  ;;  %v1360_v32 = vrot.slane %v3692_v59, 6 }
 0x3a0   :  { %3348 = vtanh.f32 %v1339_v13  ;;  %v1167_v38 = vpop.f32.mrf.mxu0  ;;  %v1244_v45 = vpop.f32.mrf.mxu1  ;;  %v1347_v48 = vmul.f32 0.5, %v1346_v42 }
 0x3a1   :  { %v1318_v39 = vmul.f32 0.5, %v1317_v35  ;;  %v1322_v36 = vadd.f32 %v1244_v45, %v1171_v43  ;;  %v1172_v3 = vadd.f32 %v1167_v38, %v3686_v14 }
 0x3a3   :  { %3350 = vtanh.f32 %v1318_v39  ;;  %v1313_v44 = vpop.f32.mrf.mxu0  ;;  %v1323_v41 = vmul.f32 0.5, %v1322_v36 }
 0x3a4   :  { %3352 = vtanh.f32 %v1347_v48  ;;  %v1327_v63 = vadd.f32 %v1313_v44, %v3682_v5 }
 0x3a5   :  { %v3263_v47 = vpop.f32.mrf.mxu0  ;;  %3354 = vtanh.f32 %v1323_v41 }
 0x3ad   :  { %v3349_v50 = vpop.eup %3348 }
 0x3ae   :  { %v1341_v54 = vadd.f32 1.0, %v3349_v50 }
 0x3b0   :  { %v3351_v37 = vpop.eup %3350  ;;  %v1342_v56 = vmul.f32 0.5, %v1341_v54 }
 0x3b1   :  { %v1320_v55 = vadd.f32 1.0, %v3351_v37  ;;  %v3353_v4 = vpop.eup %3352 }
 0x3b2   :  { %v1355_v60 = vmul.f32 %v1353_v57, %v1342_v56  ;;  %v1349_v1 = vadd.f32 1.0, %v3353_v4  ;;  %v3355_v12 = vpop.eup %3354 }
 0x3b3   :  { %v1321_v62 = vmul.f32 0.5, %v1320_v55  ;;  %v1325_v15 = vadd.f32 1.0, %v3355_v12 }
 0x3b4   :  { %v1356_v0 = vadd.f32 %v1355_v60, %v3584_v2  ;;  %v1350_v13 = vmul.f32 0.5, %v1349_v1 }
 0x3b5   :  { %v1328_v40 = vmul.f32 %v1327_v63, %v1321_v62  ;;  %v1326_v39 = vmul.f32 0.5, %v1325_v15 }
 0x3b6   :  { %3356 = vtanh.f32 %v1356_v0  ;;  %v1358_v16 = vsub.f32 1.0, %v1350_v13  ;;  %v1362_v43 = vmul.f32 %v1360_v32, %v1350_v13 }
 0x3b7   :  { %v1329_v6 = vadd.f32 %v1328_v40, %v1172_v3  ;;  %v1331_v38 = vsub.f32 1.0, %v1326_v39  ;;  %v1333_v36 = vmul.f32 %v1326_v39, %v3703_v17 }
 0x3b9   :  { %3358 = vtanh.f32 %v1329_v6 }
 0x3c3   :  { %v3357_v35 = vpop.eup %3356 }
 0x3c4   :  { %v1359_v42 = vmul.f32 %v3357_v35, %v1358_v16 }
 0x3c6   :  { %v3359_v44 = vpop.eup %3358  ;;  %v3739_v45 = vadd.f32 %v1362_v43, %v1359_v42 }
 0x3c7   :  { %v1332_v48 = vmul.f32 %v3359_v44, %v1331_v38 }
 0x3c8   :  { %v1365_v47 = vrot.slane %v3739_v45, 4 }
 0x3c9   :  { %v3751_v59 = vadd.f32 %v1333_v36, %v1332_v48 }
 0x3ca   :  { %3175 = vmatmul.mubr.msk.f32.vlgmr.msra.gmra.mxu1 %vm383_vm3, %v1365_v47  ;;  %3176 = vmatmul.mubr.msk.f32.vlgmr.msra.gmra.mxu0 %vm383_vm3, %v1365_v47 }
 0x3cb   :  { %1539 = vmatpush1.msra.mxu1 %v3592_v18  ;;  %1616 = vmatpush1.msra.mxu0 %v3597_v19 }
 0x3cc   :  { %1540 = vmatprep.subr.mxu1 %v3602_v20  ;;  %1617 = vmatprep.subr.mxu0 %v3607_v21 }
 0x3cd   :  { %1541 = vmatpush1.msra.mxu1 %v3616_v22  ;;  %1574 = vmatprep.mubr.f32.mxu1 %v3419_v7 }
 0x3ce   :  { %1618 = vmatpush1.msra.mxu0 %v3623_v23  ;;  %1651 = vmatprep.mubr.f32.mxu0 %v3419_v7 }
 0x3cf   :  { %3177 = vmatmul.mubr.msk.f32.vlgmr.msra.gmra.mxu1 %vm383_vm3, %v1365_v47  ;;  %3178 = vmatmul.mubr.msk.f32.vlgmr.msra.gmra.mxu0 %vm383_vm3, %v3751_v59 }
 0x3d0   :  { %3264 = vmatprep.subr.mxu1 %v3419_v7  ;;  %3268 = vmatprep.mubr.msk.f32.mxu1 %vm3420_vm4, %v3419_v7 }
 0x3d1   :  { %3265 = vmatpush3.msra.mxu1 %v3634_v24  ;;  %1807 = vmatprep.subr.mxu0 %v3511_v26 }
 0x3d2   :  { %3266 = vmatprep.subr.mxu1 %v3419_v7  ;;  %1808 = vmatpush1.msra.mxu0 %v3518_v28 }
 0x3d3   :  { %3267 = vmatpush3.msra.mxu1 %v3643_v25  ;;  %1809 = vmatprep.subr.mxu0 %v3523_v29 }
 0x3d4   :  { %3269 = vmatmul.mubr.msk.f32.vlgmr.msra.gmra.mxu1 %vm383_vm3, %v3751_v59  ;;  %1878 = vmatprep.subr.mxu1 %v3478_v8 }
 0x3d5   :  { %1879 = vmatpush1.msra.mxu1 %v3483_v9  ;;  %1810 = vmatpush1.msra.mxu0 %v3528_v30 }
 0x3d6   :  { %1880 = vmatprep.subr.mxu1 %v3488_v10  ;;  %1843 = vmatprep.mubr.f32.mxu0 %v3419_v7 }
 0x3d7   :  { %1881 = vmatpush1.msra.mxu1 %v3494_v11  ;;  %1914 = vmatprep.mubr.f32.mxu1 %v3419_v7 }
 0x3d8   :  { %1949 = vmatprep.subr.mxu0 %v3543_v33  ;;  %2026 = vmatprep.subr.mxu1 %v3548_v34 }
 0x48a   :  { %v1434_v17 = vpop.f32.mrf.mxu1  ;;  %v1505_v41 = vpop.f32.mrf.mxu0 }
 0x48b   :  { %v1747_v27 = vrot.slane %v1434_v17, 2  ;;  %v1762_v16 = vadd.f32 %v1505_v41, %v3581_v61 }
 0x48c   :  { %v1436_v50 = vpop.f32.mrf.mxu1  ;;  %v1507_v54 = vpop.f32.mrf.mxu0 }
 0x48d   :  { %v1749_v37 = vadd.f32 %v1747_v27, %v3572_v53  ;;  %v1581_v56 = vadd.f32 %v1507_v54, %v3668_v31  ;;  %v1755_v55 = vrot.slane %v1436_v50, 2  ;;  %v1764_v43 = vrot.slane %v1762_v16, 2 }
 0x48f   :  { %v1750_v57 = vmul.f32 0.5, %v1749_v37  ;;  %v1576_v60 = vpop.f32.mrf.mxu1  ;;  %v1653_v62 = vpop.f32.mrf.mxu0  ;;  %v1757_v40 = vadd.f32 %v1755_v55, %v3575_v58  ;;  %v1771_v55 = vrot.slane %v3739_v45, 6 }
 0x490   :  { %v1728_v63 = vadd.f32 %v1653_v62, %v1581_v56  ;;  %v1582_v4 = vadd.f32 %v1576_v60, %v3674_v52 }
 0x491   :  { %3360 = vtanh.f32 %v1750_v57  ;;  %v1578_v0 = vpop.f32.mrf.mxu1  ;;  %v1655_v1 = vpop.f32.mrf.mxu0  ;;  %v1758_v13 = vmul.f32 0.5, %v1757_v40 }
 0x492   :  { %v1729_v3 = vmul.f32 0.5, %v1728_v63  ;;  %v1733_v53 = vadd.f32 %v1655_v1, %v1582_v4  ;;  %v1583_v36 = vadd.f32 %v1578_v0, %v3686_v14 }
 0x494   :  { %3362 = vtanh.f32 %v1729_v3  ;;  %v1724_v6 = vpop.f32.mrf.mxu1  ;;  %v1734_v15 = vmul.f32 0.5, %v1733_v53 }
 0x495   :  { %3364 = vtanh.f32 %v1758_v13  ;;  %v1738_v47 = vadd.f32 %v1724_v6, %v3682_v5 }
 0x496   :  { %v3270_v12 = vpop.f32.mrf.mxu1  ;;  %3366 = vtanh.f32 %v1734_v15 }
 0x49e   :  { %v3361_v32 = vpop.eup %3360 }
 0x49f   :  { %v1752_v35 = vadd.f32 1.0, %v3361_v32 }
 0x4a1   :  { %v3363_v39 = vpop.eup %3362  ;;  %v1753_v42 = vmul.f32 0.5, %v1752_v35 }
 0x4a2   :  { %v1731_v44 = vadd.f32 1.0, %v3363_v39  ;;  %v3365_v27 = vpop.eup %3364 }
 0x4a3   :  { %v1766_v58 = vmul.f32 %v1764_v43, %v1753_v42  ;;  %v1760_v41 = vadd.f32 1.0, %v3365_v27  ;;  %v3367_v54 = vpop.eup %3366 }
 0x4a4   :  { %v1732_v38 = vmul.f32 0.5, %v1731_v44  ;;  %v1736_v56 = vadd.f32 1.0, %v3367_v54 }
 0x4a5   :  { %v1767_v48 = vadd.f32 %v1766_v58, %v3584_v2  ;;  %v1761_v37 = vmul.f32 0.5, %v1760_v41 }
 0x4a6   :  { %v1739_v17 = vmul.f32 %v1738_v47, %v1732_v38  ;;  %v1737_v62 = vmul.f32 0.5, %v1736_v56 }
 0x4a7   :  { %3368 = vtanh.f32 %v1767_v48  ;;  %v1769_v57 = vsub.f32 1.0, %v1761_v37  ;;  %v1773_v3 = vmul.f32 %v1771_v55, %v1761_v37 }
 0x4a8   :  { %v1740_v50 = vadd.f32 %v1739_v17, %v1583_v36  ;;  %v1742_v4 = vsub.f32 1.0, %v1737_v62  ;;  %v1744_v1 = vmul.f32 %v1737_v62, %v3751_v59 }
 0x4aa   :  { %3370 = vtanh.f32 %v1740_v50 }
 0x4b4   :  { %v3369_v60 = vpop.eup %3368 }
 0x4b5   :  { %v1770_v63 = vmul.f32 %v3369_v60, %v1769_v57 }
 0x4b7   :  { %v3371_v40 = vpop.eup %3370  ;;  %v1774_v2 = vadd.f32 %v1773_v3, %v1770_v63 }
 0x4b8   :  { %v1743_v6 = vmul.f32 %v3371_v40, %v1742_v4 }
 0x4b9   :  { %v3787_v0 = vrot.slane %v1774_v2, 6 }
 0x4ba   :  { %v3800_v45 = vadd.f32 %v1744_v1, %v1743_v6 }
 0x4bb   :  { %3180 = vmatmul.mubr.msk.f32.vlgmr.msra.gmra.mxu0 %vm383_vm3, %v3787_v0  ;;  %3181 = vmatmul.mubr.msk.f32.vlgmr.msra.gmra.mxu1 %vm383_vm3, %v3787_v0 }
 0x4bc   :  { %1950 = vmatpush1.msra.mxu0 %v3592_v18  ;;  %2027 = vmatpush1.msra.mxu1 %v3597_v19 }
 0x4bd   :  { %1951 = vmatprep.subr.mxu0 %v3602_v20  ;;  %2028 = vmatprep.subr.mxu1 %v3607_v21 }
 0x4be   :  { %1952 = vmatpush1.msra.mxu0 %v3616_v22  ;;  %1985 = vmatprep.mubr.f32.mxu0 %v3419_v7 }
 0x4bf   :  { %2029 = vmatpush1.msra.mxu1 %v3623_v23  ;;  %2062 = vmatprep.mubr.f32.mxu1 %v3419_v7 }
 0x4c0   :  { %3182 = vmatmul.mubr.msk.f32.vlgmr.msra.gmra.mxu0 %vm383_vm3, %v3787_v0  ;;  %3183 = vmatmul.mubr.msk.f32.vlgmr.msra.gmra.mxu1 %vm383_vm3, %v3800_v45 }
 0x4c1   :  { %3271 = vmatprep.subr.mxu0 %v3419_v7  ;;  %3275 = vmatprep.mubr.msk.f32.mxu0 %vm3420_vm4, %v3419_v7 }
 0x4c2   :  { %3272 = vmatpush3.msra.mxu0 %v3634_v24  ;;  %2207 = vmatprep.subr.mxu1 %v3511_v26 }
 0x4c3   :  { %3273 = vmatprep.subr.mxu0 %v3419_v7  ;;  %2208 = vmatpush1.msra.mxu1 %v3518_v28 }
 0x4c4   :  { %3274 = vmatpush3.msra.mxu0 %v3643_v25  ;;  %2209 = vmatprep.subr.mxu1 %v3523_v29 }
 0x4c5   :  { %3276 = vmatmul.mubr.msk.f32.vlgmr.msra.gmra.mxu0 %vm383_vm3, %v3800_v45  ;;  %2278 = vmatprep.subr.mxu0 %v3478_v8 }
 0x4c6   :  { %2279 = vmatpush1.msra.mxu0 %v3483_v9  ;;  %2210 = vmatpush1.msra.mxu1 %v3528_v30 }
 0x4c7   :  { %2280 = vmatprep.subr.mxu0 %v3488_v10  ;;  %2243 = vmatprep.mubr.f32.mxu1 %v3419_v7 }
 0x4c8   :  { %2281 = vmatpush1.msra.mxu0 %v3494_v11  ;;  %2314 = vmatprep.mubr.f32.mxu0 %v3419_v7 }
 0x4c9   :  { %2349 = vmatprep.subr.mxu1 %v3543_v33  ;;  %2426 = vmatprep.subr.mxu0 %v3548_v34 }
 0x57b   :  { %v1845_v26 = vpop.f32.mrf.mxu0  ;;  %v1916_v28 = vpop.f32.mrf.mxu1 }
 0x57c   :  { %v2157_v29 = vadd.f32 %v1845_v26, %v3564_v46  ;;  %v2167_v17 = vadd.f32 %v1916_v28, %v3581_v61 }
 0x57d   :  { %v1847_v59 = vpop.f32.mrf.mxu0  ;;  %v1918_v9 = vpop.f32.mrf.mxu1 }
 0x57e   :  { %v2158_v12 = vmul.f32 0.5, %v2157_v29  ;;  %v1992_v30 = vadd.f32 %v1918_v9, %v3668_v31  ;;  %v2162_v11 = vadd.f32 %v1847_v59, %v3568_v49 }
 0x580   :  { %3372 = vtanh.f32 %v2158_v12  ;;  %v1987_v13 = vpop.f32.mrf.mxu0  ;;  %v2064_v53 = vpop.f32.mrf.mxu1  ;;  %v2163_v43 = vmul.f32 0.5, %v2162_v11 }
 0x581   :  { %v2139_v15 = vadd.f32 %v2064_v53, %v1992_v30  ;;  %v1993_v32 = vadd.f32 %v1987_v13, %v3674_v52 }
 0x582   :  { %v1989_v16 = vpop.f32.mrf.mxu0  ;;  %v2066_v39 = vpop.f32.mrf.mxu1 }
 0x583   :  { %v2140_v35 = vmul.f32 0.5, %v2139_v15  ;;  %v2144_v44 = vadd.f32 %v2066_v39, %v1993_v32  ;;  %v1994_v55 = vadd.f32 %v1989_v16, %v3686_v14 }
 0x585   :  { %3374 = vtanh.f32 %v2140_v35  ;;  %v2135_v42 = vpop.f32.mrf.mxu0  ;;  %v2145_v38 = vmul.f32 0.5, %v2144_v44 }
 0x586   :  { %3376 = vtanh.f32 %v2163_v43  ;;  %v2149_v56 = vadd.f32 %v2135_v42, %v3682_v5 }
 0x587   :  { %v3277_v58 = vpop.f32.mrf.mxu0  ;;  %3378 = vtanh.f32 %v2145_v38 }
 0x58d   :  { %v3373_v47 = vpop.eup %3372 }
 0x58e   :  { %v2160_v48 = vadd.f32 1.0, %v3373_v47 }
 0x590   :  { %v2161_v36 = vmul.f32 0.5, %v2160_v48 }
 0x592   :  { %v3375_v27 = vpop.eup %3374  ;;  %v2168_v50 = vmul.f32 %v2167_v17, %v2161_v36 }
 0x593   :  { %v2142_v41 = vadd.f32 1.0, %v3375_v27  ;;  %v3377_v57 = vpop.eup %3376 }
 0x594   :  { %v2169_v54 = vadd.f32 %v2168_v50, %v3570_v51  ;;  %v2165_v63 = vadd.f32 1.0, %v3377_v57  ;;  %v3379_v3 = vpop.eup %3378 }
 0x595   :  { %v2143_v37 = vmul.f32 0.5, %v2142_v41  ;;  %v2147_v2 = vadd.f32 1.0, %v3379_v3 }
 0x596   :  { %3380 = vtanh.f32 %v2169_v54  ;;  %v2166_v40 = vmul.f32 0.5, %v2165_v63 }
 0x597   :  { %v2150_v60 = vmul.f32 %v2149_v56, %v2143_v37  ;;  %v2148_v1 = vmul.f32 0.5, %v2147_v2 }
 0x598   :  { %v2171_v4 = vsub.f32 1.0, %v2166_v40  ;;  %v2174_v28 = vmul.f32 %v2166_v40, %v3787_v0 }
 0x599   :  { %v2151_v62 = vadd.f32 %v2150_v60, %v1994_v55  ;;  %v2153_v59 = vsub.f32 1.0, %v2148_v1  ;;  %v2155_v12 = vmul.f32 %v2148_v1, %v3800_v45 }
 0x59b   :  { %3382 = vtanh.f32 %v2151_v62 }
 0x5a3   :  { %v3381_v6 = vpop.eup %3380 }
 0x5a4   :  { %v2172_v26 = vmul.f32 %v3381_v6, %v2171_v4 }
 0x5a6   :  { %v3837_v29 = vadd.f32 %v2174_v28, %v2172_v26 }
 0x5a8   :  { %v3383_v9 = vpop.eup %3382  ;;  %3185 = vmatmul.mubr.msk.f32.vlgmr.msra.gmra.mxu1 %vm383_vm3, %v3837_v29  ;;  %3186 = vmatmul.mubr.msk.f32.vlgmr.msra.gmra.mxu0 %vm383_vm3, %v3837_v29  ;;  %v2582_v6 = vrot.slane %v3837_v29, 6 }
 0x5a9   :  { %2350 = vmatpush1.msra.mxu1 %v3592_v18  ;;  %2427 = vmatpush1.msra.mxu0 %v3597_v19  ;;  %v2154_v30 = vmul.f32 %v3383_v9, %v2153_v59 }
 0x5aa   :  { %2351 = vmatprep.subr.mxu1 %v3602_v20  ;;  %2428 = vmatprep.subr.mxu0 %v3607_v21 }
 0x5ab   :  { %2352 = vmatpush1.msra.mxu1 %v3616_v22  ;;  %2385 = vmatprep.mubr.f32.mxu1 %v3419_v7  ;;  %v3850_v0 = vadd.f32 %v2155_v12, %v2154_v30 }
 0x5ac   :  { %2429 = vmatpush1.msra.mxu0 %v3623_v23  ;;  %2462 = vmatprep.mubr.f32.mxu0 %v3419_v7 }
 0x5ad   :  { %3187 = vmatmul.mubr.msk.f32.vlgmr.msra.gmra.mxu1 %vm383_vm3, %v3837_v29  ;;  %3188 = vmatmul.mubr.msk.f32.vlgmr.msra.gmra.mxu0 %vm383_vm3, %v3850_v0 }
 0x5ae   :  { %3278 = vmatprep.subr.mxu1 %v3419_v7  ;;  %3282 = vmatprep.mubr.msk.f32.mxu1 %vm3420_vm4, %v3419_v7 }
 0x5af   :  { %3279 = vmatpush3.msra.mxu1 %v3634_v24  ;;  %2618 = vmatprep.subr.mxu0 %v3592_v18 }
 0x5b0   :  { %3280 = vmatprep.subr.mxu1 %v3419_v7  ;;  %2619 = vmatpush1.msra.mxu0 %v3478_v8  ;;  %v2893_v8 = vld [vmem:[%s3972_s1] sm:$0x3] }
 0x5b1   :  { %3281 = vmatpush3.msra.mxu1 %v3643_v25  ;;  %2620 = vmatprep.subr.mxu0 %v3616_v22 }
 0x5b2   :  { %3283 = vmatmul.mubr.msk.f32.vlgmr.msra.gmra.mxu1 %vm383_vm3, %v3850_v0  ;;  %3285 = vmatprep.subr.mxu1 %v3419_v7 }
 0x5b3   :  { %3286 = vmatpush3.msra.mxu1 %v3543_v33  ;;  %2621 = vmatpush1.msra.mxu0 %v3488_v10 }
 0x5b4   :  { %3287 = vmatprep.subr.mxu1 %v3419_v7  ;;  %2654 = vmatprep.mubr.f32.mxu0 %v3419_v7 }
 0x5b5   :  { %3288 = vmatpush3.msra.mxu1 %v3602_v20  ;;  %3289 = vmatprep.mubr.msk.f32.mxu1 %vm3420_vm4, %v3419_v7 }
 0x5b6   :  { %2762 = vmatprep.subr.mxu0 %v3548_v34  ;;  %3292 = vmatprep.subr.mxu1 %v3419_v7 }
 0x5b7   :  { %2895 = vrot.lane.b32.xlu0 %v2893_v8, %s3421_s26 }
 0x668   :  { %v2245_v10 = vpop.f32.mrf.mxu1  ;;  %v2316_v33 = vpop.f32.mrf.mxu0 }
 0x669   :  { %v2558_v18 = vrot.slane %v2245_v10, 6  ;;  %v2573_v48 = vadd.f32 %v2316_v33, %v3581_v61 }
 0x66a   :  { %v2247_v22 = vpop.f32.mrf.mxu1  ;;  %v2318_v45 = vpop.f32.mrf.mxu0 }
 0x66b   :  { %v2560_v20 = vadd.f32 %v2558_v18, %v3564_v46  ;;  %v2392_v13 = vadd.f32 %v2318_v45, %v3668_v31  ;;  %v2566_v15 = vrot.slane %v2247_v22, 6  ;;  %v2575_v41 = vrot.slane %v2573_v48, 6  ;;  %v3155_v18 = vld [vmem:[%s3146_s18 + $0x10] sm:$0x1]  ;;  %v3156_v22 = vld [vmem:[%s3148_s21 + $0x20] sm:$0x1] }
 0x66c   :  { %v49_v45 = vadd.f32 %v3156_v22, %v3155_v18 }
 0x66d   :  { %v2561_v53 = vmul.f32 0.5, %v2560_v20  ;;  %v2387_v34 = vpop.f32.mrf.mxu1  ;;  %v2464_v11 = vpop.f32.mrf.mxu0  ;;  %v2568_v39 = vadd.f32 %v2566_v15, %v3568_v49 }
 0x66e   :  { %v2539_v16 = vadd.f32 %v2464_v11, %v2392_v13  ;;  %v2393_v42 = vadd.f32 %v2387_v34, %v3674_v52  ;;  %50 = vst.msk [vmem:[#allocation2 + $0x1] sm:$0x1] %vm39_vm6, %v49_v45 }
 0x66f   :  { %3384 = vtanh.f32 %v2561_v53  ;;  %v2389_v32 = vpop.f32.mrf.mxu1  ;;  %v2466_v44 = vpop.f32.mrf.mxu0  ;;  %v2569_v38 = vmul.f32 0.5, %v2568_v39 }
 0x670   :  { %v2540_v35 = vmul.f32 0.5, %v2539_v16  ;;  %v2544_v46 = vadd.f32 %v2466_v44, %v2393_v42  ;;  %v2394_v55 = vadd.f32 %v2389_v32, %v3686_v14 }
 0x672   :  { %3386 = vtanh.f32 %v2540_v35  ;;  %v2535_v43 = vpop.f32.mrf.mxu1  ;;  %v2545_v47 = vmul.f32 0.5, %v2544_v46 }
 0x673   :  { %3388 = vtanh.f32 %v2569_v38  ;;  %v2549_v56 = vadd.f32 %v2535_v43, %v3682_v5 }
 0x674   :  { %v3284_v58 = vpop.f32.mrf.mxu1  ;;  %3390 = vtanh.f32 %v2545_v47 }
 0x67c   :  { %v3385_v36 = vpop.eup %3384 }
 0x67d   :  { %v2563_v17 = vadd.f32 1.0, %v3385_v36 }
 0x67f   :  { %v3387_v27 = vpop.eup %3386  ;;  %v2564_v50 = vmul.f32 0.5, %v2563_v17 }
 0x680   :  { %v2542_v54 = vadd.f32 1.0, %v3387_v27  ;;  %v3389_v62 = vpop.eup %3388 }
 0x681   :  { %v2577_v49 = vmul.f32 %v2575_v41, %v2564_v50  ;;  %v2571_v61 = vadd.f32 1.0, %v3389_v62  ;;  %v3391_v3 = vpop.eup %3390  ;;  %v101_v62 = vld [vmem:[%s3973_s2 + $0x48] sm:$0xff] }
 0x682   :  { %v2543_v37 = vmul.f32 0.5, %v2542_v54  ;;  %v2547_v2 = vadd.f32 1.0, %v3391_v3 }
 0x683   :  { %v2578_v57 = vadd.f32 %v2577_v49, %v3570_v51  ;;  %v2572_v40 = vmul.f32 0.5, %v2571_v61 }
 0x684   :  { %v2550_v60 = vmul.f32 %v2549_v56, %v2543_v37  ;;  %v2548_v26 = vmul.f32 0.5, %v2547_v2 }
 0x685   :  { %3392 = vtanh.f32 %v2578_v57  ;;  %v2580_v4 = vsub.f32 1.0, %v2572_v40  ;;  %v2584_v59 = vmul.f32 %v2582_v6, %v2572_v40  ;;  %v3197_v40 = vld [vmem:[%s3973_s2 + $0x69] ss:$0 sm:$0xff] }
 0x686   :  { %v2551_v63 = vadd.f32 %v2550_v60, %v2394_v55  ;;  %v2553_v12 = vsub.f32 1.0, %v2548_v26  ;;  %v2555_v10 = vmul.f32 %v2548_v26, %v3850_v0  ;;  %v3152_v0 = vld [vmem:[%s3144_s15 + $0x20] sm:$0x1]  ;;  %v102_v60 = vld [vmem:[%s3973_s2 + $0x50] sm:$0xff] }
 0x688   :  { %3394 = vtanh.f32 %v2551_v63 }
 0x692   :  { %v3393_v1 = vpop.eup %3392 }
 0x693   :  { %v2581_v28 = vmul.f32 %v3393_v1, %v2580_v4 }
 0x695   :  { %v3395_v9 = vpop.eup %3394  ;;  %v2585_v51 = vadd.f32 %v2584_v59, %v2581_v28 }
 0x696   :  { %v2554_v8 = vmul.f32 %v3395_v9, %v2553_v12 }
 0x697   :  { %v2587_v30 = vrot.slane %v2585_v51, 2 }
 0x698   :  { %v3900_v29 = vadd.f32 %v2555_v10, %v2554_v8 }
 0x699   :  { %3190 = vmatmul.mubr.msk.f32.vlgmr.msra.gmra.mxu0 %vm383_vm3, %v2587_v30  ;;  %3290 = vmatmul.mubr.msk.f32.vlgmr.msra.gmra.mxu1 %vm383_vm3, %v2587_v30 }
 0x69a   :  { %2763 = vmatpush1.msra.mxu0 %v3597_v19  ;;  %3293 = vmatpush3.msra.mxu1 %v3634_v24  ;;  %v99_v19 = vld [vmem:[%s3973_s2 + $0x40] sm:$0xf]  ;;  %v97_v24 = vld [vmem:[%s3973_s2 + $0x30] sm:$0xff] }
 0x69b   :  { %2764 = vmatprep.subr.mxu0 %v3607_v21  ;;  %3294 = vmatprep.subr.mxu1 %v3419_v7  ;;  %v98_v21 = vld [vmem:[%s3973_s2 + $0x38] sm:$0xff] }
 0x69c   :  { %2765 = vmatpush1.msra.mxu0 %v3623_v23  ;;  %2798 = vmatprep.mubr.f32.mxu0 %v3419_v7  ;;  %v2896_v23 = vpop.permute.xlu0 %2895 }
 0x69d   :  { %3295 = vmatpush3.msra.mxu1 %v3643_v25  ;;  %3296 = vmatprep.mubr.msk.f32.mxu1 %vm3420_vm4, %v3419_v7  ;;  %v3151_v25 = vld [vmem:[%s3142_s12 + $0x10] sm:$0x1] }
 0x69e   :  { %3192 = vmatmul.mubr.msk.f32.vlgmr.msra.gmra.mxu0 %vm383_vm3, %v3900_v29  ;;  %3297 = vmatmul.mubr.msk.f32.vlgmr.msra.gmra.mxu1 %vm383_vm3, %v3900_v29  ;;  %v38_v33 = vadd.f32 %v3152_v0, %v3151_v25 }
 0x69f   :  { %3299 = vmatprep.subr.mxu0 %v3419_v7  ;;  %3304 = vmatprep.subr.mxu1 %v3419_v7 }
 0x6a0   :  { %3301 = vmatprep.mubr.msk.f32.mxu0 %vm3420_vm4, %v3419_v7  ;;  %3308 = vmatprep.mubr.msk.f32.mxu1 %vm3420_vm4, %v3419_v7  ;;  %40 = vst.msk [vmem:[#allocation2] sm:$0x1] %vm39_vm6, %v38_v33 }
 0x6a1   :  { %3300 = vmatpush3.msk.msra.mxu0 %vm119_vm0, %v99_v19  ;;  %3305 = vmatpush3.msra.mxu1 %v98_v21 }
 0x6a2   :  { %3306 = vmatprep.subr.mxu1 %v3419_v7  ;;  %3302 = vmatmul.mubr.msk.f32.vlgmr.msra.gmra.mxu0 %vm2897_vm5, %v2896_v23 }
 0x6a3   :  { %3307 = vmatpush3.msra.mxu1 %v97_v24  ;;  %3311 = vmatprep.subr.mxu0 %v3419_v7 }
 0x6a4   :  { %3319 = vmatprep.mubr.msk.f32.mxu0 %vm3420_vm4, %v3419_v7 }
 0x6a7   :  { %v3046_v61 = vld [vmem:[#allocation2] sm:$0x3] }
 0x759   :  { %v2656_v20 = vpop.f32.mrf.mxu0  ;;  %v2727_v13 = vpop.f32.mrf.mxu1 }
 0x75a   :  { %v2657_v34 = vadd.f32 %v2656_v20, %v3668_v31  ;;  %v2728_v36 = vadd.f32 %v2727_v13, %v3686_v14  ;;  %v103_v14 = vld [vmem:[%s3973_s2 + $0x58] sm:$0xff] }
 0x75b   :  { %v2658_v53 = vpop.f32.mrf.mxu0  ;;  %v3291_v15 = vpop.f32.mrf.mxu1 }
 0x75c   :  { %v2659_v43 = vadd.f32 %v2658_v53, %v3674_v52 }
 0x75e   :  { %v2800_v11 = vpop.f32.mrf.mxu0  ;;  %v2871_v16 = vpop.f32.mrf.mxu1 }
 0x75f   :  { %v2875_v32 = vadd.f32 %v2800_v11, %v2657_v34  ;;  %v2885_v48 = vadd.f32 %v2871_v16, %v3682_v5  ;;  %v104_v5 = vld [vmem:[%s3973_s2 + $0x60] sm:$0xff] }
 0x760   :  { %v3298_v35 = vpop.f32.mrf.mxu1  ;;  %v2802_v42 = vpop.f32.mrf.mxu0  ;;  %3312 = vmatpush3.msra.mxu0 %v104_v5 }
 0x761   :  { %v2876_v39 = vmul.f32 0.5, %v2875_v32  ;;  %v2880_v44 = vadd.f32 %v2802_v42, %v2659_v43  ;;  %3313 = vmatprep.subr.mxu0 %v3419_v7 }
 0x762   :  { %v2969_v57 = vpop.f32.mrf.mxu0  ;;  %3314 = vmatpush3.msra.mxu0 %v103_v14 }
 0x763   :  { %3396 = vtanh.f32 %v2876_v39  ;;  %v2881_v58 = vmul.f32 0.5, %v2880_v44  ;;  %3315 = vmatprep.subr.mxu0 %v3419_v7 }
 0x764   :  { %v3303_v55 = vpop.f32.mrf.mxu0  ;;  %3316 = vmatpush3.msra.mxu0 %v102_v60 }
 0x765   :  { %3398 = vtanh.f32 %v2881_v58  ;;  %3317 = vmatprep.subr.mxu0 %v3419_v7  ;;  %v3198_v7 = vld [vmem:[%s3973_s2 + $0x6a] ss:$0 sm:$0xff] }
 0x766   :  { %3318 = vmatpush3.msra.mxu0 %v101_v62 }
 0x770   :  { %v3397_v38 = vpop.eup %3396 }
 0x771   :  { %v2878_v46 = vadd.f32 1.0, %v3397_v38 }
 0x772   :  { %v3399_v27 = vpop.eup %3398 }
 0x773   :  { %v2879_v47 = vmul.f32 0.5, %v2878_v46  ;;  %v2883_v50 = vadd.f32 1.0, %v3399_v27 }
 0x775   :  { %v2886_v31 = vmul.f32 %v2885_v48, %v2879_v47  ;;  %v2884_v41 = vmul.f32 0.5, %v2883_v50 }
 0x777   :  { %v2887_v17 = vadd.f32 %v2886_v31, %v2728_v36  ;;  %v2889_v54 = vsub.f32 1.0, %v2884_v41  ;;  %v2891_v37 = vmul.f32 %v2884_v41, %v3900_v29 }
 0x779   :  { %3400 = vtanh.f32 %v2887_v17 }
 0x786   :  { %v3401_v49 = vpop.eup %3400 }
 0x787   :  { %v2890_v52 = vmul.f32 %v3401_v49, %v2889_v54 }
 0x789   :  { %v2892_v56 = vadd.f32 %v2891_v37, %v2890_v52 }
 0x78b   :  { %3309 = vmatmul.mubr.msk.f32.vlgmr.msra.gmra.mxu1 %vm383_vm3, %v2892_v56 }
 0x84b   :  { %v3042_v63 = vpop.f32.mrf.mxu1 }
 0x84c   :  { %v3043_v3 = vadd.f32 %v3042_v63, %v2969_v57 }
 0x84d   :  { %v3310_v2 = vpop.f32.mrf.mxu1 }
 0x84e   :  { %v3047_v4 = vadd.f32 %v3046_v61, %v3043_v3 }
 0x850   :  { %v3052_v6 = vadd.f32 %v3197_v40, %v3047_v4 }
 0x852   :  { %v3053_v1 = vmul.f32 0.5, %v3052_v6 }
 0x854   :  { %3402 = vtanh.f32 %v3053_v1 }
 0x861   :  { %v3403_v26 = vpop.eup %3402 }
 0x862   :  { %v3055_v28 = vadd.f32 1.0, %v3403_v26 }
 0x864   :  { %v3056_v59 = vmul.f32 0.5, %v3055_v28 }
 0x866   :  { %v3057_v9 = vmul.f32 %v3056_v59, %v3052_v6 }
 0x868   :  { %3320 = vmatmul.mubr.msk.f32.vlgmr.msra.gmra.mxu0 %vm3062_vm7, %v3057_v9 }
 0x928   :  { %v3132_v51 = vpop.f32.mrf.mxu0 }
 0x929   :  { %v3133_v12 = vadd.f32 %v3198_v7, %v3132_v51 }
 0x92a   :  { %v3321_v30 = vpop.f32.mrf.mxu0 }
 0x92b   :  { %3136 = vst [vmem:[%s3975_s4] sm:$0x3] %v3133_v12 }
 0x92c   :  { %3141 = vsyncpa [#allocation4], 1 }

</bundles_post_ra>
